<compile_context>
chip_gen: v6e
topology: v6e:2x2x1
jax: 0.10.0
libtpu: 0.0.40
codegen_flags: <defaults>
</compile_context>

<pallas_src>
import math
from functools import partial

import jax
import jax.numpy as jnp
from jax.experimental import pallas as pl
from jax.experimental.pallas import tpu as pltpu

_VMEM_LIMIT = 32 * 1024 * 1024  # safe on v5e/v6e (128 MiB) and v7x (64 MiB)


def _round_up(x, m):
    return (x + m - 1) // m * m


# ---------------------------------------------------------------------------
# Tiling plans (shared by param-build and call time so layouts always match).
# ---------------------------------------------------------------------------
def _k_plan(K):
    """(padded K, K tile): tile is a 128 multiple or equals the full dim."""
    if K % 128 == 0:
        for t in (512, 384, 256, 128):
            if K % t == 0:
                return K, t
    if K <= 1024:
        return K, K                      # full-dim block, no padding
    Kp = _round_up(K, 512)
    return Kp, 512                       # pad (folded into im2col / weight prep)


def _n_plan(N):
    if N <= 512:
        return N                         # full-dim block, no padding
    for t in (512, 384, 256, 128):
        if N % t == 0:
            return t
    return N                             # e.g. 576 / 960: single full block


def _m_plan(M):
    pm = _round_up(M, 8)
    if pm <= 512:
        return pm, pm
    for t in (512, 256, 128):
        if pm % t == 0:
            return pm, t
    pm = _round_up(pm, 256)
    return pm, 256


# ---------------------------------------------------------------------------
# Fused matmul kernel: out = act( A @ B + bias [+ residual] ), bf16 MXU,
# f32 accumulation, optional input ReLU.
# ---------------------------------------------------------------------------
def _matmul_kernel(*refs, act, pre_act, has_residual):
    if has_residual:
        a_ref, b_ref, bias_ref, res_ref, o_ref, acc_ref = refs
    else:
        a_ref, b_ref, bias_ref, o_ref, acc_ref = refs
        res_ref = None
    k = pl.program_id(2)

    @pl.when(k == 0)
    def _():
        acc_ref[...] = jnp.zeros_like(acc_ref)

    a = a_ref[...]
    if pre_act == "relu":
        a = jnp.maximum(a, 0)
    acc_ref[...] += jnp.dot(a, b_ref[...], preferred_element_type=jnp.float32)

    @pl.when(k == pl.num_programs(2) - 1)
    def _():
        r = acc_ref[...] + bias_ref[...]
        if has_residual:
            r = r + res_ref[...].astype(jnp.float32)
        if act == "relu6":
            r = jnp.clip(r, 0.0, 6.0)
        elif act == "relu":
            r = jnp.maximum(r, 0.0)
        elif act == "leaky":
            r = jnp.where(r >= 0.0, r, 0.2 * r)
        o_ref[...] = r.astype(o_ref.dtype)


def matmul_bias_act(a, wm, bias, *, act="none", pre_act="none", residual=None,
                    out_dtype=jnp.bfloat16):
    """a: (M, K); wm: (Kp, N) bf16 pre-padded weights; bias: (1, N) f32."""
    M, Ka = a.shape
    Kp, N = wm.shape
    pm, tm = _m_plan(M)
    tn = _n_plan(N)
    _, tk = _k_plan(Kp)

    a = a.astype(jnp.bfloat16)
    if Ka < Kp:                           # not hit on the fast paths
        a = jnp.pad(a, ((0, 0), (0, Kp - Ka)))
    if pm > M:
        a = jnp.pad(a, ((0, pm - M), (0, 0)))
        if residual is not None:
            residual = jnp.pad(residual, ((0, pm - M), (0, 0)))

    in_specs = [
        pl.BlockSpec((tm, tk), lambda i, j, k: (i, k)),
        pl.BlockSpec((tk, tn), lambda i, j, k: (k, j)),
        pl.BlockSpec((1, tn), lambda i, j, k: (0, j)),
    ]
    inputs = [a, wm, bias]
    has_residual = residual is not None
    if has_residual:
        in_specs.append(pl.BlockSpec((tm, tn), lambda i, j, k: (i, j)))
        inputs.append(residual.astype(jnp.bfloat16))

    grid = (pm // tm, N // tn, Kp // tk)
    out = pl.pallas_call(
        partial(_matmul_kernel, act=act, pre_act=pre_act,
                has_residual=has_residual),
        out_shape=jax.ShapeDtypeStruct((pm, N), out_dtype),
        grid_spec=pltpu.PrefetchScalarGridSpec(
            num_scalar_prefetch=0,
            grid=grid,
            in_specs=in_specs,
            out_specs=pl.BlockSpec((tm, tn), lambda i, j, k: (i, j)),
            scratch_shapes=[pltpu.VMEM((tm, tn), jnp.float32)],
        ),
        compiler_params=pltpu.CompilerParams(
            dimension_semantics=("parallel", "parallel", "arbitrary"),
            vmem_limit_bytes=_VMEM_LIMIT),
    )(*inputs)
    if pm > M:
        out = out[:M]
    return out


# ---------------------------------------------------------------------------
# Depthwise 3x3 conv (pad=1) + folded-BN bias + ReLU6.  bf16 input, f32 acc,
# row-by-row accumulation.  Stride 2 computes only the Ho x Wo output using an
# even/odd column split prepared once in the wrapper.
# ---------------------------------------------------------------------------
def _dw_kernel_s1(x_ref, w_ref, b_ref, o_ref):
    Ho, Wo = o_ref.shape[1], o_ref.shape[2]
    C = o_ref.shape[3]
    w = w_ref[...]                      # (9, 1, C) f32
    b = b_ref[...]                      # (1, C) f32
    for h in range(Ho):
        acc = jnp.zeros((Wo, C), jnp.float32)
        for dy in range(3):
            row = x_ref[0, h + dy, :, :].astype(jnp.float32)   # (Wp, C)
            for dx in range(3):
                acc = acc + row[dx:dx + Wo, :] * w[dy * 3 + dx]
        o_ref[0, h, :, :] = jnp.clip(acc + b, 0.0, 6.0).astype(o_ref.dtype)


def _dw_kernel_s2(xe_ref, xo_ref, w_ref, b_ref, o_ref):
    Ho, Wo = o_ref.shape[1], o_ref.shape[2]
    C = o_ref.shape[3]
    w = w_ref[...]                      # (9, 1, C) f32
    b = b_ref[...]                      # (1, C) f32
    for h in range(Ho):
        acc = jnp.zeros((Wo, C), jnp.float32)
        for dy in range(3):
            r = 2 * h + dy
            row_e = xe_ref[0, r, :, :].astype(jnp.float32)      # even cols
            row_o = xo_ref[0, r, :, :].astype(jnp.float32)      # odd cols
            acc = acc + row_e[0:Wo, :] * w[dy * 3 + 0]
            acc = acc + row_o[0:Wo, :] * w[dy * 3 + 1]
            acc = acc + row_e[1:1 + Wo, :] * w[dy * 3 + 2]
        o_ref[0, h, :, :] = jnp.clip(acc + b, 0.0, 6.0).astype(o_ref.dtype)


def depthwise3x3_relu6(x, p, *, stride=1):
    N, H, W, C = x.shape
    xp = jnp.pad(x.astype(jnp.bfloat16), ((0, 0), (1, 1), (1, 1), (0, 0)))
    Hp, Wp = H + 2, W + 2
    cparams = pltpu.CompilerParams(dimension_semantics=("parallel",),
                                   vmem_limit_bytes=_VMEM_LIMIT)
    if stride == 1:
        return pl.pallas_call(
            _dw_kernel_s1,
            out_shape=jax.ShapeDtypeStruct((N, H, W, C), jnp.bfloat16),
            grid_spec=pltpu.PrefetchScalarGridSpec(
                num_scalar_prefetch=0,
                grid=(N,),
                in_specs=[
                    pl.BlockSpec((1, Hp, Wp, C), lambda n: (n, 0, 0, 0)),
                    pl.BlockSpec((9, 1, C), lambda n: (0, 0, 0)),
                    pl.BlockSpec((1, C), lambda n: (0, 0)),
                ],
                out_specs=pl.BlockSpec((1, H, W, C), lambda n: (n, 0, 0, 0)),
            ),
            compiler_params=cparams,
        )(xp, p["w"], p["b"])

    assert stride == 2 and H % 2 == 0 and W % 2 == 0
    Ho, Wo = H // 2, W // 2
    xe = xp[:, :, 0::2, :]               # (N, Hp, Wo + 1, C)
    xo = xp[:, :, 1::2, :]               # (N, Hp, Wo + 1, C)
    We = xe.shape[2]
    return pl.pallas_call(
        _dw_kernel_s2,
        out_shape=jax.ShapeDtypeStruct((N, Ho, Wo, C), jnp.bfloat16),
        grid_spec=pltpu.PrefetchScalarGridSpec(
            num_scalar_prefetch=0,
            grid=(N,),
            in_specs=[
                pl.BlockSpec((1, Hp, We, C), lambda n: (n, 0, 0, 0)),
                pl.BlockSpec((1, Hp, We, C), lambda n: (n, 0, 0, 0)),
                pl.BlockSpec((9, 1, C), lambda n: (0, 0, 0)),
                pl.BlockSpec((1, C), lambda n: (0, 0)),
            ],
            out_specs=pl.BlockSpec((1, Ho, Wo, C), lambda n: (n, 0, 0, 0)),
        ),
        compiler_params=cparams,
    )(xe, xo, p["w"], p["b"])


# ---------------------------------------------------------------------------
# Convolution wrapper (1x1 direct, kxk via bf16 im2col) -> Pallas matmul.
# `x` may be a list of tensors to be concatenated along C (concat is folded
# into the im2col, never materialized).
# TODO(synk): im2col is still materialized once in HBM (bf16); fully fusing
#             the 9-tap gather into the matmul index_map needs element-offset
#             (halo) windows and is left out for robustness.
# ---------------------------------------------------------------------------
def conv2d(x, p, *, stride=1, padding=0, act="none", pre_act="none",
           residual=None, out_dtype=jnp.bfloat16):
    parts = list(x) if isinstance(x, (list, tuple)) else [x]
    N, H, W, _ = parts[0].shape
    Cin = sum(t.shape[-1] for t in parts)
    kh, kw = p["kh"], p["kw"]
    assert Cin == p["cin"]
    Kp = p["wm"].shape[0]
    Cout = p["cout"]

    if kh == 1 and kw == 1 and stride == 1 and padding == 0:
        assert len(parts) == 1
        Ho, Wo = H, W
        a = parts[0].reshape(N * H * W, Cin)          # free reshape, no pad
    else:
        Ho = (H + 2 * padding - kh) // stride + 1
        Wo = (W + 2 * padding - kw) // stride + 1
        padded = []
        for part in parts:
            part = part.astype(jnp.bfloat16)
            if pre_act == "relu":
                part = jnp.maximum(part, 0)
            padded.append(jnp.pad(
                part, ((0, 0), (padding, padding), (padding, padding), (0, 0))))
        pre_act = "none"
        patches = []
        for dy in range(kh):
            for dx in range(kw):
                for tp in padded:
                    patches.append(
                        tp[:, dy:dy + stride * (Ho - 1) + 1:stride,
                           dx:dx + stride * (Wo - 1) + 1:stride, :])
        K = kh * kw * Cin
        if Kp > K:                                    # fold K padding into concat
            patches.append(jnp.zeros((N, Ho, Wo, Kp - K), jnp.bfloat16))
        a = jnp.concatenate(patches, axis=-1).reshape(N * Ho * Wo, Kp)

    res = None
    if residual is not None:
        res = residual.reshape(N * Ho * Wo, Cout)
    out = matmul_bias_act(a, p["wm"], p["b"], act=act, pre_act=pre_act,
                          residual=res, out_dtype=out_dtype)
    return out.reshape(N, Ho, Wo, Cout)


# ---------------------------------------------------------------------------
# nn.Upsample(scale_factor=2, mode='bilinear', align_corners=True)
# TODO(synk): bilinear upsample stays as JAX gather+lerp glue; its gather
#             pattern has no clean static-BlockSpec Pallas equivalent.
# ---------------------------------------------------------------------------
def upsample2x_bilinear_align_corners(x):
    N, H, W, C = x.shape
    Ho, Wo = 2 * H, 2 * W

    def coords(n_in, n_out):
        if n_in == 1:
            src = jnp.zeros((n_out,), jnp.float32)
        else:
            src = jnp.arange(n_out, dtype=jnp.float32) * ((n_in - 1) / (n_out - 1))
        i0 = jnp.clip(jnp.floor(src).astype(jnp.int32), 0, n_in - 1)
        i1 = jnp.clip(i0 + 1, 0, n_in - 1)
        frac = src - i0.astype(jnp.float32)
        return i0, i1, frac

    h0, h1, fh = coords(H, Ho)
    w0, w1, fw = coords(W, Wo)
    xf = x.astype(jnp.float32)
    xh = (jnp.take(xf, h0, axis=1) * (1.0 - fh)[None, :, None, None]
          + jnp.take(xf, h1, axis=1) * fh[None, :, None, None])
    out = (jnp.take(xh, w0, axis=2) * (1.0 - fw)[None, None, :, None]
           + jnp.take(xh, w1, axis=2) * fw[None, None, :, None])
    return out.astype(jnp.bfloat16)


# ---------------------------------------------------------------------------
# Deterministic parameter construction (replaces pretrained weights), laid out
# in kernel-ready form (bf16 matmul weights with pre-padded K, f32 bias).
# ---------------------------------------------------------------------------
class _Keys:
    def __init__(self, seed):
        self._key = jax.random.PRNGKey(seed)

    def __call__(self):
        self._key, k = jax.random.split(self._key)
        return k


def _conv_w(kg, shape):
    fan_in = shape[1] * shape[2] * shape[3]
    return jax.random.normal(kg(), shape, jnp.float32) * (1.0 / math.sqrt(fan_in))


def _bn(kg, c):
    gamma = 1.0 + 0.05 * jax.random.normal(kg(), (c,), jnp.float32)
    beta = 0.05 * jax.random.normal(kg(), (c,), jnp.float32)
    mean = 0.05 * jax.random.normal(kg(), (c,), jnp.float32)
    var = 1.0 + 0.05 * jax.random.uniform(kg(), (c,), jnp.float32)
    return gamma, beta, mean, var


def _fold_bn(w, bn, eps=1e-5):
    gamma, beta, mean, var = bn
    scale = gamma / jnp.sqrt(var + eps)
    return w * scale[:, None, None, None], beta - mean * scale


def _prep_conv(w, bias):
    """w: (Cout, Cin, kh, kw) f32; bias: (Cout,) -> kernel-ready layout."""
    Cout, Cin, kh, kw = w.shape
    K = kh * kw * Cin
    Kp, _ = _k_plan(K)
    wm = jnp.transpose(w, (2, 3, 1, 0)).reshape(K, Cout)
    if Kp > K:
        wm = jnp.pad(wm, ((0, Kp - K), (0, 0)))
    return {"wm": wm.astype(jnp.bfloat16),
            "b": bias.reshape(1, Cout).astype(jnp.float32),
            "kh": kh, "kw": kw, "cin": Cin, "cout": Cout}


def _prep_dw(w, bias):
    """w: (C, 1, 3, 3) f32; bias: (C,) -> (9, 1, C) weights + (1, C) bias."""
    C = w.shape[0]
    wk = jnp.transpose(w[:, 0], (1, 2, 0)).reshape(9, 1, C).astype(jnp.float32)
    return {"w": wk, "b": bias.reshape(1, C).astype(jnp.float32)}


_MBV2_CFG = [
    # t, c, n, s
    (1, 16, 1, 1),
    (6, 24, 2, 2),
    (6, 32, 3, 2),
    (6, 64, 4, 2),
    (6, 96, 3, 1),
    (6, 160, 3, 2),
    (6, 320, 1, 1),
]


def make_encoder_params(kg):
    # TODO(synk): pretrained torchvision MobileNetV2 weights are replaced by
    #             deterministic random init with identical shapes.
    params = []
    w, bn = _conv_w(kg, (32, 3, 3, 3)), _bn(kg, 32)
    wf, bf = _fold_bn(w, bn)
    params.append({"type": "conv", "p": _prep_conv(wf, bf),
                   "stride": 2, "pad": 1, "act": "relu6"})
    in_c = 32
    for t, c, n, s in _MBV2_CFG:
        for i in range(n):
            stride = s if i == 0 else 1
            hidden = in_c * t
            blk = {"type": "ir", "stride": stride, "in": in_c, "out": c,
                   "pw": None}
            if t != 1:
                w, bn = _conv_w(kg, (hidden, in_c, 1, 1)), _bn(kg, hidden)
                blk["pw"] = _prep_conv(*_fold_bn(w, bn))
            w, bn = _conv_w(kg, (hidden, 1, 3, 3)), _bn(kg, hidden)
            blk["dw"] = _prep_dw(*_fold_bn(w, bn))
            w, bn = _conv_w(kg, (c, hidden, 1, 1)), _bn(kg, c)
            blk["pwl"] = _prep_conv(*_fold_bn(w, bn))
            params.append(blk)
            in_c = c
    w, bn = _conv_w(kg, (1280, 320, 1, 1)), _bn(kg, 1280)
    wf, bf = _fold_bn(w, bn)
    params.append({"type": "conv", "p": _prep_conv(wf, bf),
                   "stride": 1, "pad": 0, "act": "relu6"})
    return params


def make_decoder_params(kg, encoder_out=1280, skip=96):
    b1_in, b1_out = encoder_out + skip, encoder_out // 2
    b2_in, b2_out = b1_out + skip // 3, b1_out // 2
    b3_in, b3_out = b2_out + skip // 4, b2_out // 2
    b4_in, b4_out = b3_out + skip // 6, b3_out // 2

    def conv(cout, cin, k):
        w = _conv_w(kg, (cout, cin, k, k))
        b = 0.01 * jax.random.normal(kg(), (cout,), jnp.float32)
        return _prep_conv(w, b)

    return {
        "conv2": conv(encoder_out, encoder_out, 1),
        "block1": {"A": conv(b1_out, b1_in, 3), "B": conv(b1_out, b1_out, 3)},
        "block2": {"A": conv(b2_out, b2_in, 3), "B": conv(b2_out, b2_out, 3)},
        "block3": {"A": conv(b3_out, b3_in, 3), "B": conv(b3_out, b3_out, 3)},
        "block4": {"A": conv(b4_out, b4_in, 3), "B": conv(b4_out, b4_out, 3)},
        "conv3": conv(1, b4_out, 3),
    }


# ---------------------------------------------------------------------------
# Forward passes.
# ---------------------------------------------------------------------------
def _inverted_residual(x, blk):
    h = x
    if blk["pw"] is not None:
        h = conv2d(h, blk["pw"], act="relu6")
    h = depthwise3x3_relu6(h, blk["dw"], stride=blk["stride"])
    use_res = blk["stride"] == 1 and blk["in"] == blk["out"]
    # residual add fused into the pointwise-linear matmul epilogue
    return conv2d(h, blk["pwl"], act="none", residual=x if use_res else None)


def encoder_forward(x, enc_params):
    outs = [x]
    for blk in enc_params:
        cur = outs[-1]
        if blk["type"] == "conv":
            out = conv2d(cur, blk["p"], stride=blk["stride"],
                         padding=blk["pad"], act=blk["act"])
        else:
            out = _inverted_residual(cur, blk)
        outs.append(out)
    return outs


def decoder_block(x, skip, p):
    up = upsample2x_bilinear_align_corners(x)
    # torch.cat([up, skip], dim=C) folded into convA's im2col
    a = conv2d([up, skip], p["A"], stride=1, padding=1, act="none")
    return conv2d(a, p["B"], stride=1, padding=1, act="leaky")


def mob_v2_forward(x_nchw, enc_params, dec_params):
    # layout: NCHW (PyTorch) -> NHWC (bf16) internally -> NCHW (f32) output
    x = jnp.transpose(x_nchw, (0, 2, 3, 1)).astype(jnp.bfloat16)
    feats = encoder_forward(x, enc_params)
    conv1, pool1, pool2, pool3, enc_out = (
        feats[2], feats[4], feats[7], feats[14], feats[19])
    e = conv2d(enc_out, dec_params["conv2"], act="none", pre_act="relu")
    b1 = decoder_block(e, pool3, dec_params["block1"])
    b2 = decoder_block(b1, pool2, dec_params["block2"])
    b3 = decoder_block(b2, pool1, dec_params["block3"])
    b4 = decoder_block(b3, conv1, dec_params["block4"])
    depth = conv2d(b4, dec_params["conv3"], stride=1, padding=1, act="none",
                   out_dtype=jnp.float32)
    return jnp.transpose(depth, (0, 3, 1, 2))


if __name__ == "__main__":
    kg = _Keys(42)
    enc_params = make_encoder_params(kg)
    dec_params = make_decoder_params(kg, encoder_out=1280, skip=96)

    x = jax.random.normal(jax.random.PRNGKey(0), (2, 3, 64, 64), jnp.float32)
    depth = mob_v2_forward(x, enc_params, dec_params)
    depth = jax.block_until_ready(depth)

    assert depth.shape == (2, 1, 32, 32), depth.shape
    assert bool(jnp.all(jnp.isfinite(depth)))
    print("KERNEL_OK")
</pallas_src>

<mosaic_0001>
module attributes {stable_mosaic.version = 11 : i64} {
  func.func @_matmul_kernel(%arg0: i32, %arg1: i32, %arg2: i32, %arg3: memref<512x27xbf16, #tpu.memory_space<vmem>>, %arg4: memref<27x32xbf16, #tpu.memory_space<vmem>>, %arg5: memref<1x32xf32, #tpu.memory_space<vmem>>, %arg6: memref<512x32xbf16, #tpu.memory_space<vmem>>, %arg7: memref<512x32xf32, #tpu.memory_space<vmem>>) attributes {dimension_semantics = [#tpu.dimension_semantics<parallel>, #tpu.dimension_semantics<parallel>, #tpu.dimension_semantics<arbitrary>], iteration_bounds = array<i64: 4, 1, 1>, scalar_prefetch = 0 : i64, scratch_operands = 1 : i64, tpu.core_type = #tpu.core_type<tc>, window_params = [{transform_indices = @transform_0, window_bounds = array<i64: 512, 27>}, {transform_indices = @transform_1, window_bounds = array<i64: 27, 32>}, {transform_indices = @transform_2, window_bounds = array<i64: 1, 32>}, {transform_indices = @transform_3, window_bounds = array<i64: 512, 32>}]} {
    %c0_i32 = arith.constant 0 : i32
    %0 = arith.cmpi eq, %arg2, %c0_i32 : i32
    %1 = arith.extui %0 : i1 to i32
    %c0_i32_0 = arith.constant 0 : i32
    %2 = arith.cmpi ne, %1, %c0_i32_0 : i32
    scf.if %2 {
      %cst_10 = arith.constant 0.000000e+00 : f32
      %12 = vector.broadcast %cst_10 : f32 to vector<512x32xf32>
      %c0_11 = arith.constant 0 : index
      %c0_12 = arith.constant 0 : index
      %13 = vector.load %arg7[%c0_11, %c0_12] : memref<512x32xf32, #tpu.memory_space<vmem>>, vector<512x32xf32>
      tpu.vector_store %arg7[%c0_11, %c0_12], %12 {strides = array<i32>} : memref<512x32xf32, #tpu.memory_space<vmem>>, vector<512x32xf32>,
    } else {
    }
    %c0 = arith.constant 0 : index
    %c0_1 = arith.constant 0 : index
    %3 = vector.load %arg3[%c0, %c0_1] : memref<512x27xbf16, #tpu.memory_space<vmem>>, vector<512x27xbf16>
    %c0_2 = arith.constant 0 : index
    %c0_3 = arith.constant 0 : index
    %4 = vector.load %arg7[%c0_2, %c0_3] : memref<512x32xf32, #tpu.memory_space<vmem>>, vector<512x32xf32>
    %c0_4 = arith.constant 0 : index
    %c0_5 = arith.constant 0 : index
    %5 = vector.load %arg4[%c0_4, %c0_5] : memref<27x32xbf16, #tpu.memory_space<vmem>>, vector<27x32xbf16>
    %cst = arith.constant dense<0.000000e+00> : vector<512x32xf32>
    %6 = tpu.matmul %3, %5, %cst {dimension_numbers = #tpu.dot_dimension_numbers<[1], [0], [0], [1], [0, 0, 1, 1], [], []>} : vector<512x27xbf16>, vector<27x32xbf16>, vector<512x32xf32> -> vector<512x32xf32>
    %7 = arith.addf %4, %6 : vector<512x32xf32>
    %c0_6 = arith.constant 0 : index
    %c0_7 = arith.constant 0 : index
    %8 = vector.load %arg7[%c0_6, %c0_7] : memref<512x32xf32, #tpu.memory_space<vmem>>, vector<512x32xf32>
    tpu.vector_store %arg7[%c0_6, %c0_7], %7 {strides = array<i32>} : memref<512x32xf32, #tpu.memory_space<vmem>>, vector<512x32xf32>,
    %c0_i32_8 = arith.constant 0 : i32
    %9 = arith.cmpi eq, %arg2, %c0_i32_8 : i32
    %10 = arith.extui %9 : i1 to i32
    %c0_i32_9 = arith.constant 0 : i32
    %11 = arith.cmpi ne, %10, %c0_i32_9 : i32
    scf.if %11 {
      %c0_10 = arith.constant 0 : index
      %c0_11 = arith.constant 0 : index
      %12 = vector.load %arg7[%c0_10, %c0_11] : memref<512x32xf32, #tpu.memory_space<vmem>>, vector<512x32xf32>
      %c0_12 = arith.constant 0 : index
      %c0_13 = arith.constant 0 : index
      %13 = vector.load %arg5[%c0_12, %c0_13] : memref<1x32xf32, #tpu.memory_space<vmem>>, vector<1x32xf32>
      %14 = vector.broadcast %13 : vector<1x32xf32> to vector<512x32xf32>
      %15 = arith.addf %12, %14 : vector<512x32xf32>
      %cst_14 = arith.constant 0.000000e+00 : f32
      %cst_15 = arith.constant 6.000000e+00 : f32
      %16 = vector.broadcast %cst_14 : f32 to vector<512x32xf32>
      %17 = arith.maximumf %16, %15 : vector<512x32xf32>
      %18 = vector.broadcast %cst_15 : f32 to vector<512x32xf32>
      %19 = arith.minimumf %18, %17 : vector<512x32xf32>
      %20 = arith.truncf %19 : vector<512x32xf32> to vector<512x32xbf16>
      %c0_16 = arith.constant 0 : index
      %c0_17 = arith.constant 0 : index
      %21 = vector.load %arg6[%c0_16, %c0_17] : memref<512x32xbf16, #tpu.memory_space<vmem>>, vector<512x32xbf16>
      tpu.vector_store %arg6[%c0_16, %c0_17], %20 {strides = array<i32>} : memref<512x32xbf16, #tpu.memory_space<vmem>>, vector<512x32xbf16>,
    } else {
    }
    return
  }
  func.func @transform_0(%arg0: i32, %arg1: i32, %arg2: i32) -> (i32, i32) {
    %c0_i32 = arith.constant 0 : i32
    return %arg0, %arg2 : i32, i32
  }
  func.func @transform_1(%arg0: i32, %arg1: i32, %arg2: i32) -> (i32, i32) {
    %c0_i32 = arith.constant 0 : i32
    return %arg2, %arg1 : i32, i32
  }
  func.func @transform_2(%arg0: i32, %arg1: i32, %arg2: i32) -> (i32, i32) {
    %c0_i32 = arith.constant 0 : i32
    %c0_i32_0 = arith.constant 0 : i32
    return %c0_i32, %arg1 : i32, i32
  }
  func.func @transform_3(%arg0: i32, %arg1: i32, %arg2: i32) -> (i32, i32) {
    %c0_i32 = arith.constant 0 : i32
    return %arg0, %arg1 : i32, i32
  }
}

</mosaic_0001>

<bundles_post_ra>
// kernel: tpu_custom_call.1
= control target key start
LH: loop header
LB: loop body
LE: loop exit
PB: predicated region body
PF: predicated region fallthrough
CT: control target
= control target key end

     0   :  { %s2273_s12 = smov 0   ;;  %s2275_s13 = smov 0   ;;  %s2874_s0 = inlined_call_operand.vmem [shape: bf16[2048,27], index: 0, kind: input, shape index: {}]   ;;  %s2875_s1 = inlined_call_operand.vmem [shape: bf16[27,32], index: 1, kind: input, shape index: {}]   ;;  %s2876_s2 = inlined_call_operand.vmem [shape: f32[1,32], index: 2, kind: input, shape index: {}]   ;;  %s2877_s3 = inlined_call_operand.vmem [shape: bf16[2048,32], index: 3, kind: output, shape index: {}]  }
   0x1   :  { %s2277_s14 = smov 0  }
   0x2 LB: > { %s32_s15 = sadd.s32 1, %s2245_s13  ;;  %p1858_p0 = scmp.ge.s32.totalorder %s2249_s14, 1  ;;  %s2249_s14 = sphi %s2277_s14, %s13_s14   ;;  %s2245_s13 = sphi %s2275_s13, %s2880_s13   ;;  %s2241_s12 = sphi %s2273_s12, %s2879_s12  }
   0x3   : > { %p34_p1 = scmp.ge.s32.totalorder %s32_s15, 4  ;;  %p188_p2 = scmp.lt.s32.totalorder %s2249_s14, 5 }
   0x5   : > { %s2882_s15 = smov (%p34_p1, %s32_s15), 0  ;;  %p189_p3 = pnand %p1858_p0, %p188_p2 }
   0x6   : > { %s1859_s18 = sshll.u32 (!%p189_p3), %s2241_s12, 6 }
   0x7   : > { %192 = sbr.rel (%p189_p3) target bundleno = 323 (0x143), region = 32  ;;  %p2299_p4 = scmp.lt.s32.totalorder (!%p189_p3), %s1859_s18, 255 }
   0xc   : > { %v2192_v0 = vld [vmem:[%s2875_s1 + $0x8] sm:$0x3f]   ;;  %vm729_vm0 = vcmask 1044480   ;;  %vm730_vm1 = vcmask 1045504   ;;  %v2251_v1 = vmov 65535   ;;  %vm264_vm2 = vcmask 261120  }
   0xd   : > { %v731_v2 = vsel %vm729_vm0, 4294967295, %v2251_v1  ;;  %v2308_v5 = vld [vmem:[%s2875_s1] sm:$0xff]   ;;  %v2252_v6 = vmov 0.0   ;;  %s2884_s18 = smov (!%p2299_p4, %s1859_s18), 255  ;;  %vm632_vm3 = vcmask 220160   ;;  %vm1676_vm4 = vcmask 257024  }
   0xe   : > { %v732_v3 = vsel %vm730_vm1, %v731_v2, 0  ;;  %267 = vst.msk [vmem:[#allocation2 + $0x10] sm:$0xff] %vm264_vm2, %v2252_v6  ;;  %265 = vst.msk [vmem:[#allocation2] sm:$0xff] %vm264_vm2, %v2252_v6  ;;  %s1860_s22 = sshll.u32 %s2884_s18, 2  ;;  %v2533_v1 = vld [vmem:[%s2876_s2] ss:$0 sm:$0xff] }
   0xf   : > { %v2303_v4 = vand.u32 %v2192_v0, %v732_v3  ;;  %266 = vst.msk [vmem:[#allocation2 + $0x8] sm:$0xff] %vm264_vm2, %v2252_v6  ;;  %268 = vst.msk [vmem:[#allocation2 + $0x18] sm:$0xff] %vm264_vm2, %v2252_v6  ;;  %s2456_s25 = scalar_lea.vmem %s2874_s0, %s1860_s22  ;;  %s2550_s30 = scalar_lea.vmem %s2877_s3, %s1860_s22 }
  0x10   : > { %269 = vst.msk [vmem:[#allocation2 + $0x20] sm:$0xff] %vm264_vm2, %v2252_v6  ;;  %270 = vst.msk [vmem:[#allocation2 + $0x28] sm:$0xff] %vm264_vm2, %v2252_v6  ;;  %v2194_v7 = vld [vmem:[%s2456_s25] sm:$0xff]   ;;  %v2196_v9 = vld [vmem:[%s2456_s25 + $0x8] sm:$0xff]  }
  0x11   : > { %271 = vst.msk [vmem:[#allocation2 + $0x30] sm:$0xff] %vm264_vm2, %v2252_v6  ;;  %272 = vst.msk [vmem:[#allocation2 + $0x38] sm:$0xff] %vm264_vm2, %v2252_v6  ;;  %2094 = vmatprep.subr.bf16.mxu0 %v2303_v4  ;;  %2162 = vmatprep.subr.bf16.mxu1 %v2303_v4  ;;  %v2195_v8 = vld [vmem:[%s2456_s25 + $0x80] sm:$0xff]   ;;  %v2197_v10 = vld [vmem:[%s2456_s25 + $0x88] sm:$0xff]  }
  0x12   : > { %273 = vst.msk [vmem:[#allocation2 + $0x40] sm:$0xff] %vm264_vm2, %v2252_v6  ;;  %274 = vst.msk [vmem:[#allocation2 + $0x48] sm:$0xff] %vm264_vm2, %v2252_v6  ;;  %2095 = vmatpush3.bf16.msra.mxu0 %v2303_v4  ;;  %2164 = vmatpush3.bf16.msra.mxu1 %v2303_v4  ;;  %v2198_v11 = vld [vmem:[%s2456_s25 + $0x10] sm:$0xff]   ;;  %v2200_v13 = vld [vmem:[%s2456_s25 + $0x18] sm:$0xff]  }
  0x13   : > { %275 = vst.msk [vmem:[#allocation2 + $0x50] sm:$0xff] %vm264_vm2, %v2252_v6  ;;  %276 = vst.msk [vmem:[#allocation2 + $0x58] sm:$0xff] %vm264_vm2, %v2252_v6  ;;  %2096 = vmatprep.subr.bf16.mxu0 %v2308_v5  ;;  %2163 = vmatprep.subr.bf16.mxu1 %v2308_v5  ;;  %v2199_v12 = vld [vmem:[%s2456_s25 + $0x90] sm:$0xff]   ;;  %v2201_v14 = vld [vmem:[%s2456_s25 + $0x98] sm:$0xff]  }
  0x14   : > { %277 = vst.msk [vmem:[#allocation2 + $0x60] sm:$0xff] %vm264_vm2, %v2252_v6  ;;  %278 = vst.msk [vmem:[#allocation2 + $0x68] sm:$0xff] %vm264_vm2, %v2252_v6  ;;  %2098 = vmatprep.mubr.msk.bf16.mxu0 %vm632_vm3, %v2194_v7  ;;  %2130 = vmatprep.mubr.msk.bf16.mxu1 %vm632_vm3, %v2195_v8  ;;  %v2202_v15 = vld [vmem:[%s2456_s25 + $0x20] sm:$0xff]   ;;  %v2204_v17 = vld [vmem:[%s2456_s25 + $0x28] sm:$0xff]  }
  0x15   : > { %279 = vst.msk [vmem:[#allocation2 + $0x70] sm:$0xff] %vm264_vm2, %v2252_v6  ;;  %280 = vst.msk [vmem:[#allocation2 + $0x78] sm:$0xff] %vm264_vm2, %v2252_v6  ;;  %v2203_v16 = vld [vmem:[%s2456_s25 + $0xa0] sm:$0xff]   ;;  %v2205_v18 = vld [vmem:[%s2456_s25 + $0xa8] sm:$0xff]  }
  0x16   : > { %281 = vst.msk [vmem:[#allocation2 + $0x80] sm:$0xff] %vm264_vm2, %v2252_v6  ;;  %282 = vst.msk [vmem:[#allocation2 + $0x88] sm:$0xff] %vm264_vm2, %v2252_v6  ;;  %2097 = vmatpush3.bf16.msra.mxu0 %v2308_v5  ;;  %2165 = vmatpush3.bf16.msra.mxu1 %v2308_v5  ;;  %v2206_v19 = vld [vmem:[%s2456_s25 + $0x30] sm:$0xff]   ;;  %v2208_v21 = vld [vmem:[%s2456_s25 + $0x38] sm:$0xff]  }
  0x17   : > { %283 = vst.msk [vmem:[#allocation2 + $0x90] sm:$0xff] %vm264_vm2, %v2252_v6  ;;  %284 = vst.msk [vmem:[#allocation2 + $0x98] sm:$0xff] %vm264_vm2, %v2252_v6  ;;  %v2207_v20 = vld [vmem:[%s2456_s25 + $0xb0] sm:$0xff]   ;;  %v2209_v22 = vld [vmem:[%s2456_s25 + $0xb8] sm:$0xff]  }
  0x18   : > { %285 = vst.msk [vmem:[#allocation2 + $0xa0] sm:$0xff] %vm264_vm2, %v2252_v6  ;;  %286 = vst.msk [vmem:[#allocation2 + $0xa8] sm:$0xff] %vm264_vm2, %v2252_v6  ;;  %v2210_v23 = vld [vmem:[%s2456_s25 + $0x40] sm:$0xff]   ;;  %v2212_v25 = vld [vmem:[%s2456_s25 + $0x48] sm:$0xff]  }
  0x19   : > { %287 = vst.msk [vmem:[#allocation2 + $0xb0] sm:$0xff] %vm264_vm2, %v2252_v6  ;;  %288 = vst.msk [vmem:[#allocation2 + $0xb8] sm:$0xff] %vm264_vm2, %v2252_v6  ;;  %2099 = vmatmul.mubr.msk.bf16.vlgmr.msra.gmra.mxu0 %vm632_vm3, %v2196_v9  ;;  %2131 = vmatmul.mubr.msk.bf16.vlgmr.msra.gmra.mxu1 %vm632_vm3, %v2197_v10  ;;  %v2211_v24 = vld [vmem:[%s2456_s25 + $0xc0] sm:$0xff]   ;;  %v2213_v26 = vld [vmem:[%s2456_s25 + $0xc8] sm:$0xff]  }
  0x1a   : > { %289 = vst.msk [vmem:[#allocation2 + $0xc0] sm:$0xff] %vm264_vm2, %v2252_v6  ;;  %290 = vst.msk [vmem:[#allocation2 + $0xc8] sm:$0xff] %vm264_vm2, %v2252_v6  ;;  %2102 = vmatprep.mubr.msk.bf16.mxu0 %vm632_vm3, %v2198_v11  ;;  %2134 = vmatprep.mubr.msk.bf16.mxu1 %vm632_vm3, %v2199_v12  ;;  %v2214_v27 = vld [vmem:[%s2456_s25 + $0x50] sm:$0xff]   ;;  %v2216_v29 = vld [vmem:[%s2456_s25 + $0x58] sm:$0xff]  }
  0x1b   : > { %291 = vst.msk [vmem:[#allocation2 + $0xd0] sm:$0xff] %vm264_vm2, %v2252_v6  ;;  %292 = vst.msk [vmem:[#allocation2 + $0xd8] sm:$0xff] %vm264_vm2, %v2252_v6  ;;  %v2215_v28 = vld [vmem:[%s2456_s25 + $0xd0] sm:$0xff]   ;;  %v2217_v30 = vld [vmem:[%s2456_s25 + $0xd8] sm:$0xff]  }
  0x1c   : > { %293 = vst.msk [vmem:[#allocation2 + $0xe0] sm:$0xff] %vm264_vm2, %v2252_v6  ;;  %294 = vst.msk [vmem:[#allocation2 + $0xe8] sm:$0xff] %vm264_vm2, %v2252_v6  ;;  %v2218_v31 = vld [vmem:[%s2456_s25 + $0x60] sm:$0xff]   ;;  %v2220_v33 = vld [vmem:[%s2456_s25 + $0x68] sm:$0xff]  }
  0x1d   : > { %295 = vst.msk [vmem:[#allocation2 + $0xf0] sm:$0xff] %vm264_vm2, %v2252_v6  ;;  %296 = vst.msk [vmem:[#allocation2 + $0xf8] sm:$0xff] %vm264_vm2, %v2252_v6  ;;  %v2219_v32 = vld [vmem:[%s2456_s25 + $0xe0] sm:$0xff]   ;;  %v2221_v34 = vld [vmem:[%s2456_s25 + $0xe8] sm:$0xff]  }
  0x1e   : > { %297 = vst.msk [vmem:[#allocation2 + $0x100] sm:$0xff] %vm264_vm2, %v2252_v6  ;;  %298 = vst.msk [vmem:[#allocation2 + $0x108] sm:$0xff] %vm264_vm2, %v2252_v6  ;;  %v2222_v35 = vld [vmem:[%s2456_s25 + $0x70] sm:$0xff]   ;;  %v2224_v37 = vld [vmem:[%s2456_s25 + $0x78] sm:$0xff]  }
  0x1f   : > { %299 = vst.msk [vmem:[#allocation2 + $0x110] sm:$0xff] %vm264_vm2, %v2252_v6  ;;  %300 = vst.msk [vmem:[#allocation2 + $0x118] sm:$0xff] %vm264_vm2, %v2252_v6  ;;  %v2223_v36 = vld [vmem:[%s2456_s25 + $0xf0] sm:$0xff]   ;;  %v2225_v38 = vld [vmem:[%s2456_s25 + $0xf8] sm:$0xff]  }
  0x20   : > { %301 = vst.msk [vmem:[#allocation2 + $0x120] sm:$0xff] %vm264_vm2, %v2252_v6  ;;  %302 = vst.msk [vmem:[#allocation2 + $0x128] sm:$0xff] %vm264_vm2, %v2252_v6  ;;  %v395_v39 = vld [vmem:[#allocation2 + $0x10] sm:$0xff]  ;;  %v393_v43 = vld [vmem:[#allocation2] sm:$0xff] }
  0x21   : > { %303 = vst.msk [vmem:[#allocation2 + $0x130] sm:$0xff] %vm264_vm2, %v2252_v6  ;;  %304 = vst.msk [vmem:[#allocation2 + $0x138] sm:$0xff] %vm264_vm2, %v2252_v6  ;;  %2103 = vmatmul.mubr.msk.bf16.gmra.mxu0 %vm632_vm3, %v2200_v13  ;;  %2135 = vmatmul.mubr.msk.bf16.gmra.mxu1 %vm632_vm3, %v2201_v14  ;;  %v396_v49 = vld [vmem:[#allocation2 + $0x18] sm:$0xff]  ;;  %v394_v55 = vld [vmem:[#allocation2 + $0x8] sm:$0xff] }
  0x22   : > { %305 = vst.msk [vmem:[#allocation2 + $0x140] sm:$0xff] %vm264_vm2, %v2252_v6  ;;  %306 = vst.msk [vmem:[#allocation2 + $0x148] sm:$0xff] %vm264_vm2, %v2252_v6  ;;  %2106 = vmatprep.mubr.msk.bf16.mxu0 %vm632_vm3, %v2202_v15  ;;  %2138 = vmatprep.mubr.msk.bf16.mxu1 %vm632_vm3, %v2203_v16  ;;  %v399_v61 = vld [vmem:[#allocation2 + $0x30] sm:$0xff]  ;;  %v397_v4 = vld [vmem:[#allocation2 + $0x20] sm:$0xff] }
  0x23   : > { %307 = vst.msk [vmem:[#allocation2 + $0x150] sm:$0xff] %vm264_vm2, %v2252_v6  ;;  %308 = vst.msk [vmem:[#allocation2 + $0x158] sm:$0xff] %vm264_vm2, %v2252_v6  ;;  %v400_v16 = vld [vmem:[#allocation2 + $0x38] sm:$0xff] }
  0x24   : > { %309 = vst.msk [vmem:[#allocation2 + $0x160] sm:$0xff] %vm264_vm2, %v2252_v6  ;;  %310 = vst.msk [vmem:[#allocation2 + $0x168] sm:$0xff] %vm264_vm2, %v2252_v6 }
  0x25   : > { %311 = vst.msk [vmem:[#allocation2 + $0x170] sm:$0xff] %vm264_vm2, %v2252_v6  ;;  %312 = vst.msk [vmem:[#allocation2 + $0x178] sm:$0xff] %vm264_vm2, %v2252_v6  ;;  %v425_v44 = vld [vmem:[#allocation2 + $0x100] sm:$0xff]  ;;  %v426_v56 = vld [vmem:[#allocation2 + $0x108] sm:$0xff] }
  0x26   : > { %313 = vst.msk [vmem:[#allocation2 + $0x180] sm:$0xff] %vm264_vm2, %v2252_v6  ;;  %314 = vst.msk [vmem:[#allocation2 + $0x188] sm:$0xff] %vm264_vm2, %v2252_v6  ;;  %v427_v40 = vld [vmem:[#allocation2 + $0x110] sm:$0xff]  ;;  %v428_v50 = vld [vmem:[#allocation2 + $0x118] sm:$0xff] }
  0x27   : > { %315 = vst.msk [vmem:[#allocation2 + $0x190] sm:$0xff] %vm264_vm2, %v2252_v6  ;;  %316 = vst.msk [vmem:[#allocation2 + $0x198] sm:$0xff] %vm264_vm2, %v2252_v6  ;;  %v429_v5 = vld [vmem:[#allocation2 + $0x120] sm:$0xff] }
  0x28   : > { %317 = vst.msk [vmem:[#allocation2 + $0x1a0] sm:$0xff] %vm264_vm2, %v2252_v6  ;;  %318 = vst.msk [vmem:[#allocation2 + $0x1a8] sm:$0xff] %vm264_vm2, %v2252_v6  ;;  %v431_v62 = vld [vmem:[#allocation2 + $0x130] sm:$0xff] }
  0x29   : > { %319 = vst.msk [vmem:[#allocation2 + $0x1b0] sm:$0xff] %vm264_vm2, %v2252_v6  ;;  %320 = vst.msk [vmem:[#allocation2 + $0x1b8] sm:$0xff] %vm264_vm2, %v2252_v6  ;;  %2107 = vmatmul.mubr.msk.bf16.gmra.mxu0 %vm632_vm3, %v2204_v17  ;;  %2139 = vmatmul.mubr.msk.bf16.gmra.mxu1 %vm632_vm3, %v2205_v18  ;;  %v432_v17 = vld [vmem:[#allocation2 + $0x138] sm:$0xff] }
  0x2a   : > { %321 = vst.msk [vmem:[#allocation2 + $0x1c0] sm:$0xff] %vm264_vm2, %v2252_v6  ;;  %322 = vst.msk [vmem:[#allocation2 + $0x1c8] sm:$0xff] %vm264_vm2, %v2252_v6  ;;  %2110 = vmatprep.mubr.msk.bf16.mxu0 %vm632_vm3, %v2206_v19  ;;  %2142 = vmatprep.mubr.msk.bf16.mxu1 %vm632_vm3, %v2207_v20 }
  0x2b   : > { %323 = vst.msk [vmem:[#allocation2 + $0x1d0] sm:$0xff] %vm264_vm2, %v2252_v6  ;;  %324 = vst.msk [vmem:[#allocation2 + $0x1d8] sm:$0xff] %vm264_vm2, %v2252_v6 }
  0x2c   : > { %325 = vst.msk [vmem:[#allocation2 + $0x1e0] sm:$0xff] %vm264_vm2, %v2252_v6  ;;  %326 = vst.msk [vmem:[#allocation2 + $0x1e8] sm:$0xff] %vm264_vm2, %v2252_v6 }
  0x2d   : > { %327 = vst.msk [vmem:[#allocation2 + $0x1f0] sm:$0xff] %vm264_vm2, %v2252_v6  ;;  %328 = vst.msk [vmem:[#allocation2 + $0x1f8] sm:$0xff] %vm264_vm2, %v2252_v6 }
  0x31   : > { %2111 = vmatmul.mubr.msk.bf16.gmra.mxu0 %vm632_vm3, %v2208_v21  ;;  %2143 = vmatmul.mubr.msk.bf16.gmra.mxu1 %vm632_vm3, %v2209_v22 }
  0x32   : > { %2114 = vmatprep.mubr.msk.bf16.mxu0 %vm632_vm3, %v2210_v23  ;;  %2146 = vmatprep.mubr.msk.bf16.mxu1 %vm632_vm3, %v2211_v24 }
  0x39   : > { %2115 = vmatmul.mubr.msk.bf16.gmra.mxu0 %vm632_vm3, %v2212_v25  ;;  %2147 = vmatmul.mubr.msk.bf16.gmra.mxu1 %vm632_vm3, %v2213_v26  ;;  %v398_v26 = vld [vmem:[#allocation2 + $0x28] sm:$0xff] }
  0x3a   : > { %2118 = vmatprep.mubr.msk.bf16.mxu0 %vm632_vm3, %v2214_v27  ;;  %2150 = vmatprep.mubr.msk.bf16.mxu1 %vm632_vm3, %v2215_v28  ;;  %v430_v27 = vld [vmem:[#allocation2 + $0x128] sm:$0xff] }
  0x41   : > { %2119 = vmatmul.mubr.msk.bf16.gmra.mxu0 %vm632_vm3, %v2216_v29  ;;  %2151 = vmatmul.mubr.msk.bf16.gmra.mxu1 %vm632_vm3, %v2217_v30 }
  0x42   : > { %2122 = vmatprep.mubr.msk.bf16.mxu0 %vm632_vm3, %v2218_v31  ;;  %2154 = vmatprep.mubr.msk.bf16.mxu1 %vm632_vm3, %v2219_v32 }
  0x49   : > { %2123 = vmatmul.mubr.msk.bf16.gmra.mxu0 %vm632_vm3, %v2220_v33  ;;  %2155 = vmatmul.mubr.msk.bf16.gmra.mxu1 %vm632_vm3, %v2221_v34 }
  0x4a   : > { %2126 = vmatprep.mubr.msk.bf16.mxu0 %vm632_vm3, %v2222_v35  ;;  %2158 = vmatprep.mubr.msk.bf16.mxu1 %vm632_vm3, %v2223_v36 }
  0x51   : > { %2127 = vmatmul.mubr.msk.bf16.gmra.mxu0 %vm632_vm3, %v2224_v37  ;;  %2159 = vmatmul.mubr.msk.bf16.gmra.mxu1 %vm632_vm3, %v2225_v38 }
  0xd9   : > { %v2100_v41 = vpop.f32.mrf.mxu0  ;;  %v2132_v42 = vpop.f32.mrf.mxu1 }
  0xda   : > { %v1027_v45 = vadd.f32 %v2100_v41, %v395_v39  ;;  %v1059_v46 = vadd.f32 %v2132_v42, %v427_v40 }
  0xdb   : > { %v770_v47 = vpop.f32.mrf.mxu0  ;;  %v898_v48 = vpop.f32.mrf.mxu1 }
  0xdc   : > { %1092 = vst.msk [vmem:[#allocation2 + $0x10] sm:$0xff] %vm264_vm2, %v1027_v45  ;;  %1124 = vst.msk [vmem:[#allocation2 + $0x110] sm:$0xff] %vm264_vm2, %v1059_v46  ;;  %v1025_v51 = vadd.f32 %v770_v47, %v393_v43  ;;  %v1057_v52 = vadd.f32 %v898_v48, %v425_v44 }
  0xdd   : > { %v2101_v53 = vpop.f32.mrf.mxu0  ;;  %v2133_v54 = vpop.f32.mrf.mxu1 }
  0xde   : > { %1090 = vst.msk [vmem:[#allocation2] sm:$0xff] %vm264_vm2, %v1025_v51  ;;  %1122 = vst.msk [vmem:[#allocation2 + $0x100] sm:$0xff] %vm264_vm2, %v1057_v52  ;;  %v1028_v57 = vadd.f32 %v2101_v53, %v396_v49  ;;  %v1060_v58 = vadd.f32 %v2133_v54, %v428_v50 }
  0xdf   : > { %v773_v59 = vpop.f32.mrf.mxu0  ;;  %v901_v60 = vpop.f32.mrf.mxu1 }
  0xe0   : > { %1093 = vst.msk [vmem:[#allocation2 + $0x18] sm:$0xff] %vm264_vm2, %v1028_v57  ;;  %1125 = vst.msk [vmem:[#allocation2 + $0x118] sm:$0xff] %vm264_vm2, %v1060_v58  ;;  %v1026_v63 = vadd.f32 %v773_v59, %v394_v55  ;;  %v1058_v0 = vadd.f32 %v901_v60, %v426_v56 }
  0xe1   : > { %v2104_v2 = vpop.f32.mrf.mxu0  ;;  %v2136_v3 = vpop.f32.mrf.mxu1 }
  0xe2   : > { %1091 = vst.msk [vmem:[#allocation2 + $0x8] sm:$0xff] %vm264_vm2, %v1026_v63  ;;  %1123 = vst.msk [vmem:[#allocation2 + $0x108] sm:$0xff] %vm264_vm2, %v1058_v0  ;;  %v1031_v6 = vadd.f32 %v2104_v2, %v399_v61  ;;  %v1063_v7 = vadd.f32 %v2136_v3, %v431_v62 }
  0xe3   : > { %v1159_v8 = vld [vmem:[#allocation2 + $0x10] sm:$0xff]  ;;  %v786_v10 = vpop.f32.mrf.mxu0  ;;  %v914_v11 = vpop.f32.mrf.mxu1 }
  0xe4   : > { %v1191_v9 = vld [vmem:[#allocation2 + $0x110] sm:$0xff]  ;;  %v1230_v12 = vadd.f32 %v2533_v1, %v1159_v8  ;;  %1096 = vst.msk [vmem:[#allocation2 + $0x30] sm:$0xff] %vm264_vm2, %v1031_v6  ;;  %1128 = vst.msk [vmem:[#allocation2 + $0x130] sm:$0xff] %vm264_vm2, %v1063_v7  ;;  %v1029_v14 = vadd.f32 %v786_v10, %v397_v4  ;;  %v1061_v15 = vadd.f32 %v914_v11, %v429_v5 }
  0xe5   : > { %v1262_v13 = vadd.f32 %v2533_v1, %v1191_v9  ;;  %v1157_v18 = vld [vmem:[#allocation2] sm:$0xff]  ;;  %v2105_v20 = vpop.f32.mrf.mxu0  ;;  %v2137_v21 = vpop.f32.mrf.mxu1 }
  0xe6   : > { %v1189_v19 = vld [vmem:[#allocation2 + $0x100] sm:$0xff]  ;;  %v1294_v22 = vmax.f32 %v1230_v12, 0.0  ;;  %v1228_v24 = vadd.f32 %v2533_v1, %v1157_v18  ;;  %1094 = vst.msk [vmem:[#allocation2 + $0x20] sm:$0xff] %vm264_vm2, %v1029_v14  ;;  %1126 = vst.msk [vmem:[#allocation2 + $0x120] sm:$0xff] %vm264_vm2, %v1061_v15  ;;  %v1032_v30 = vadd.f32 %v2105_v20, %v400_v16  ;;  %v1064_v31 = vadd.f32 %v2137_v21, %v432_v17 }
  0xe7   : > { %v1326_v23 = vmax.f32 %v1262_v13, 0.0  ;;  %v1260_v25 = vadd.f32 %v2533_v1, %v1189_v19  ;;  %v1160_v28 = vld [vmem:[#allocation2 + $0x18] sm:$0xff]  ;;  %v789_v32 = vpop.f32.mrf.mxu0  ;;  %v917_v33 = vpop.f32.mrf.mxu1 }
  0xe8   : > { %v1192_v29 = vld [vmem:[#allocation2 + $0x118] sm:$0xff]  ;;  %v1358_v34 = vmin.f32 %v1294_v22, 6.0  ;;  %v1292_v36 = vmax.f32 %v1228_v24, 0.0  ;;  %v1231_v38 = vadd.f32 %v2533_v1, %v1160_v28  ;;  %1097 = vst.msk [vmem:[#allocation2 + $0x38] sm:$0xff] %vm264_vm2, %v1032_v30  ;;  %1129 = vst.msk [vmem:[#allocation2 + $0x138] sm:$0xff] %vm264_vm2, %v1064_v31  ;;  %v1030_v42 = vadd.f32 %v789_v32, %v398_v26  ;;  %v435_v28 = vld [vmem:[#allocation2 + $0x150] sm:$0xff] }
  0xe9   : > { %v1390_v35 = vmin.f32 %v1326_v23, 6.0  ;;  %v1324_v37 = vmax.f32 %v1260_v25, 0.0  ;;  %v1263_v39 = vadd.f32 %v2533_v1, %v1192_v29  ;;  %v1158_v40 = vld [vmem:[#allocation2 + $0x8] sm:$0xff]  ;;  %v1062_v43 = vadd.f32 %v917_v33, %v430_v27  ;;  %v2556_v44 = vpop.f32.mrf.mxu0  ;;  %v2558_v45 = vpop.f32.mrf.mxu1  ;;  %v403_v27 = vld [vmem:[#allocation2 + $0x50] sm:$0xff] }
  0xea   : > { %v1190_v41 = vld [vmem:[#allocation2 + $0x108] sm:$0xff]  ;;  %v1998_v46 = vpack.c.bf16 %v1358_v34, %v1358_v34  ;;  %v1356_v48 = vmin.f32 %v1292_v36, 6.0  ;;  %v1295_v50 = vmax.f32 %v1231_v38, 0.0  ;;  %v1229_v52 = vadd.f32 %v2533_v1, %v1158_v40  ;;  %1095 = vst.msk [vmem:[#allocation2 + $0x28] sm:$0xff] %vm264_vm2, %v1030_v42  ;;  %v433_v42 = vld [vmem:[#allocation2 + $0x140] sm:$0xff] }
  0xeb   : > { %v2030_v47 = vpack.c.bf16 %v1390_v35, %v1390_v35  ;;  %v1388_v49 = vmin.f32 %v1324_v37, 6.0  ;;  %v1327_v51 = vmax.f32 %v1263_v39, 0.0  ;;  %v1261_v53 = vadd.f32 %v2533_v1, %v1190_v41  ;;  %v1163_v54 = vld [vmem:[#allocation2 + $0x30] sm:$0xff]  ;;  %1127 = vst.msk [vmem:[#allocation2 + $0x128] sm:$0xff] %vm264_vm2, %v1062_v43  ;;  %v2564_v56 = vpop.f32.mrf.mxu0  ;;  %v2566_v57 = vpop.f32.mrf.mxu1  ;;  %v401_v37 = vld [vmem:[#allocation2 + $0x40] sm:$0xff]  ;;  %v404_v43 = vld [vmem:[#allocation2 + $0x58] sm:$0xff] }
  0xec   : > { %v1195_v55 = vld [vmem:[#allocation2 + $0x130] sm:$0xff]  ;;  %1679 = vst.msk [vmem:[%s2550_s30 + $0x8] sm:$0xf] %vm1676_vm4, %v1998_v46  ;;  %v1996_v58 = vpack.c.bf16 %v1356_v48, %v1356_v48  ;;  %v1234_v60 = vadd.f32 %v2533_v1, %v1163_v54  ;;  %v1359_v62 = vmin.f32 %v1295_v50, 6.0  ;;  %v1293_v0 = vmax.f32 %v1229_v52, 0.0  ;;  %v436_v46 = vld [vmem:[#allocation2 + $0x158] sm:$0xff] }
  0xed   : > { %1711 = vst.msk [vmem:[%s2550_s30 + $0x88] sm:$0xf] %vm1676_vm4, %v2030_v47  ;;  %v2028_v59 = vpack.c.bf16 %v1388_v49, %v1388_v49  ;;  %v1266_v61 = vadd.f32 %v2533_v1, %v1195_v55  ;;  %v1391_v63 = vmin.f32 %v1327_v51, 6.0  ;;  %v1325_v2 = vmax.f32 %v1261_v53, 0.0  ;;  %v1161_v3 = vld [vmem:[#allocation2 + $0x20] sm:$0xff]  ;;  %v2574_v5 = vpop.f32.mrf.mxu0  ;;  %v2576_v6 = vpop.f32.mrf.mxu1  ;;  %v402_v53 = vld [vmem:[#allocation2 + $0x48] sm:$0xff] }
  0xee   : > { %v1193_v4 = vld [vmem:[#allocation2 + $0x120] sm:$0xff]  ;;  %1677 = vst.msk [vmem:[%s2550_s30] sm:$0xf] %vm1676_vm4, %v1996_v58  ;;  %v1298_v7 = vmax.f32 %v1234_v60, 0.0  ;;  %v1232_v9 = vadd.f32 %v2533_v1, %v1161_v3  ;;  %v1999_v11 = vpack.c.bf16 %v1359_v62, %v1359_v62  ;;  %v1357_v13 = vmin.f32 %v1293_v0, 6.0  ;;  %v434_v54 = vld [vmem:[#allocation2 + $0x148] sm:$0xff] }
  0xef   : > { %1709 = vst.msk [vmem:[%s2550_s30 + $0x80] sm:$0xf] %vm1676_vm4, %v2028_v59  ;;  %v1330_v8 = vmax.f32 %v1266_v61, 0.0  ;;  %v1264_v10 = vadd.f32 %v2533_v1, %v1193_v4  ;;  %v2031_v12 = vpack.c.bf16 %v1391_v63, %v1391_v63  ;;  %v1389_v14 = vmin.f32 %v1325_v2, 6.0  ;;  %v2584_v15 = vpop.f32.mrf.mxu0  ;;  %v2586_v16 = vpop.f32.mrf.mxu1  ;;  %v1164_v21 = vld [vmem:[#allocation2 + $0x38] sm:$0xff]  ;;  %v407_v61 = vld [vmem:[#allocation2 + $0x70] sm:$0xff] }
  0xf0   : > { %v1362_v17 = vmin.f32 %v1298_v7, 6.0  ;;  %v1296_v19 = vmax.f32 %v1232_v9, 0.0  ;;  %v1196_v22 = vld [vmem:[#allocation2 + $0x138] sm:$0xff]  ;;  %1680 = vst.msk [vmem:[%s2550_s30 + $0xc] sm:$0xf] %vm1676_vm4, %v1999_v11  ;;  %v1997_v23 = vpack.c.bf16 %v1357_v13, %v1357_v13  ;;  %v1235_v25 = vadd.f32 %v2533_v1, %v1164_v21  ;;  %v439_v62 = vld [vmem:[#allocation2 + $0x170] sm:$0xff] }
  0xf1   : > { %v1394_v18 = vmin.f32 %v1330_v8, 6.0  ;;  %v1328_v20 = vmax.f32 %v1264_v10, 0.0  ;;  %1712 = vst.msk [vmem:[%s2550_s30 + $0x8c] sm:$0xf] %vm1676_vm4, %v2031_v12  ;;  %v2029_v24 = vpack.c.bf16 %v1389_v14, %v1389_v14  ;;  %v1267_v26 = vadd.f32 %v2533_v1, %v1196_v22  ;;  %v2112_v29 = vpop.f32.mrf.mxu0  ;;  %v2144_v30 = vpop.f32.mrf.mxu1  ;;  %v1162_v35 = vld [vmem:[#allocation2 + $0x28] sm:$0xff]  ;;  %v405_v4 = vld [vmem:[#allocation2 + $0x60] sm:$0xff] }
  0xf2   : > { %v2002_v31 = vpack.c.bf16 %v1362_v17, %v1362_v17  ;;  %v1360_v33 = vmin.f32 %v1296_v19, 6.0  ;;  %v1194_v36 = vld [vmem:[#allocation2 + $0x128] sm:$0xff]  ;;  %1678 = vst.msk [vmem:[%s2550_s30 + $0x4] sm:$0xf] %vm1676_vm4, %v1997_v23  ;;  %v1299_v38 = vmax.f32 %v1235_v25, 0.0  ;;  %v1233_v40 = vadd.f32 %v2533_v1, %v1162_v35  ;;  %v437_v7 = vld [vmem:[#allocation2 + $0x160] sm:$0xff] }
  0xf3   : > { %v2034_v32 = vpack.c.bf16 %v1394_v18, %v1394_v18  ;;  %v1392_v34 = vmin.f32 %v1328_v20, 6.0  ;;  %1710 = vst.msk [vmem:[%s2550_s30 + $0x84] sm:$0xf] %vm1676_vm4, %v2029_v24  ;;  %v1331_v39 = vmax.f32 %v1267_v26, 0.0  ;;  %v1265_v41 = vadd.f32 %v2533_v1, %v1194_v36  ;;  %v818_v47 = vpop.f32.mrf.mxu0  ;;  %v946_v48 = vpop.f32.mrf.mxu1  ;;  %v408_v8 = vld [vmem:[#allocation2 + $0x78] sm:$0xff]  ;;  %v406_v14 = vld [vmem:[#allocation2 + $0x68] sm:$0xff] }
  0xf4   : > { %1683 = vst.msk [vmem:[%s2550_s30 + $0x18] sm:$0xf] %vm1676_vm4, %v2002_v31  ;;  %v2000_v49 = vpack.c.bf16 %v1360_v33, %v1360_v33  ;;  %v1035_v51 = vadd.f32 %v2556_v44, %v403_v27  ;;  %v1067_v52 = vadd.f32 %v2558_v45, %v435_v28  ;;  %v1363_v55 = vmin.f32 %v1299_v38, 6.0  ;;  %v440_v13 = vld [vmem:[#allocation2 + $0x178] sm:$0xff]  ;;  %v438_v18 = vld [vmem:[#allocation2 + $0x168] sm:$0xff]  ;;  %v411_v20 = vld [vmem:[#allocation2 + $0x90] sm:$0xff] }
  0xf5   : > { %1715 = vst.msk [vmem:[%s2550_s30 + $0x98] sm:$0xf] %vm1676_vm4, %v2034_v32  ;;  %v2032_v50 = vpack.c.bf16 %v1392_v34, %v1392_v34  ;;  %v1395_v58 = vmin.f32 %v1331_v39, 6.0  ;;  %v1297_v59 = vmax.f32 %v1233_v40, 0.0  ;;  %v1329_v60 = vmax.f32 %v1265_v41, 0.0  ;;  %v2113_v63 = vpop.f32.mrf.mxu0  ;;  %v2145_v0 = vpop.f32.mrf.mxu1  ;;  %v443_v21 = vld [vmem:[#allocation2 + $0x190] sm:$0xff] }
  0xf6   : > { %1681 = vst.msk [vmem:[%s2550_s30 + $0x10] sm:$0xf] %vm1676_vm4, %v2000_v49  ;;  %v1033_v44 = vadd.f32 %v2564_v56, %v401_v37  ;;  %v1065_v45 = vadd.f32 %v2566_v57, %v433_v42  ;;  %v1036_v2 = vadd.f32 %v2574_v5, %v404_v43  ;;  %v1068_v3 = vadd.f32 %v2576_v6, %v436_v46  ;;  %v409_v28 = vld [vmem:[#allocation2 + $0x80] sm:$0xff]  ;;  %v412_v36 = vld [vmem:[#allocation2 + $0x98] sm:$0xff] }
  0xf7   : > { %1713 = vst.msk [vmem:[%s2550_s30 + $0x90] sm:$0xf] %vm1676_vm4, %v2032_v50  ;;  %v2003_v9 = vpack.c.bf16 %v1363_v55, %v1363_v55  ;;  %v2035_v10 = vpack.c.bf16 %v1395_v58, %v1395_v58  ;;  %v1361_v11 = vmin.f32 %v1297_v59, 6.0  ;;  %v1393_v12 = vmin.f32 %v1329_v60, 6.0  ;;  %v821_v17 = vpop.f32.mrf.mxu0  ;;  %v949_v56 = vpop.f32.mrf.mxu1  ;;  %v444_v37 = vld [vmem:[#allocation2 + $0x198] sm:$0xff]  ;;  %v410_v50 = vld [vmem:[#allocation2 + $0x88] sm:$0xff] }
  0xf8   : > { %1100 = vst.msk [vmem:[#allocation2 + $0x50] sm:$0xff] %vm264_vm2, %v1035_v51  ;;  %1132 = vst.msk [vmem:[#allocation2 + $0x150] sm:$0xff] %vm264_vm2, %v1067_v52  ;;  %v1034_v57 = vadd.f32 %v2584_v15, %v402_v53  ;;  %v1066_v5 = vadd.f32 %v2586_v16, %v434_v54  ;;  %v1039_v6 = vadd.f32 %v2112_v29, %v407_v61  ;;  %v441_v15 = vld [vmem:[#allocation2 + $0x180] sm:$0xff]  ;;  %v442_v51 = vld [vmem:[#allocation2 + $0x188] sm:$0xff] }
  0xf9   : > { %1098 = vst.msk [vmem:[#allocation2 + $0x40] sm:$0xff] %vm264_vm2, %v1033_v44  ;;  %1130 = vst.msk [vmem:[#allocation2 + $0x140] sm:$0xff] %vm264_vm2, %v1065_v45  ;;  %v1071_v19 = vadd.f32 %v2144_v30, %v439_v62  ;;  %v2001_v22 = vpack.c.bf16 %v1361_v11, %v1361_v11  ;;  %v2033_v23 = vpack.c.bf16 %v1393_v12, %v1393_v12  ;;  %v2116_v26 = vpop.f32.mrf.mxu0  ;;  %v2148_v27 = vpop.f32.mrf.mxu1 }
  0xfa   : > { %1101 = vst.msk [vmem:[#allocation2 + $0x58] sm:$0xff] %vm264_vm2, %v1036_v2  ;;  %1133 = vst.msk [vmem:[#allocation2 + $0x158] sm:$0xff] %vm264_vm2, %v1068_v3  ;;  %v1037_v24 = vadd.f32 %v818_v47, %v405_v4  ;;  %v1069_v25 = vadd.f32 %v946_v48, %v437_v7  ;;  %v1040_v16 = vadd.f32 %v2113_v63, %v408_v8 }
  0xfb   : > { %1684 = vst.msk [vmem:[%s2550_s30 + $0x1c] sm:$0xf] %vm1676_vm4, %v2003_v9  ;;  %1716 = vst.msk [vmem:[%s2550_s30 + $0x9c] sm:$0xf] %vm1676_vm4, %v2035_v10  ;;  %v1072_v29 = vadd.f32 %v2145_v0, %v440_v13  ;;  %v1038_v30 = vadd.f32 %v821_v17, %v406_v14  ;;  %v1070_v31 = vadd.f32 %v949_v56, %v438_v18  ;;  %v834_v34 = vpop.f32.mrf.mxu0  ;;  %v962_v35 = vpop.f32.mrf.mxu1 }
  0xfc   : > { %1099 = vst.msk [vmem:[#allocation2 + $0x48] sm:$0xff] %vm264_vm2, %v1034_v57  ;;  %1131 = vst.msk [vmem:[#allocation2 + $0x148] sm:$0xff] %vm264_vm2, %v1066_v5  ;;  %v1043_v32 = vadd.f32 %v2116_v26, %v411_v20  ;;  %v1075_v33 = vadd.f32 %v2148_v27, %v443_v21  ;;  %v1041_v38 = vadd.f32 %v834_v34, %v409_v28 }
  0xfd   : > { %1104 = vst.msk [vmem:[#allocation2 + $0x70] sm:$0xff] %vm264_vm2, %v1039_v6  ;;  %1136 = vst.msk [vmem:[#allocation2 + $0x170] sm:$0xff] %vm264_vm2, %v1071_v19  ;;  %v1073_v39 = vadd.f32 %v962_v35, %v441_v15  ;;  %v2117_v42 = vpop.f32.mrf.mxu0  ;;  %v2149_v43 = vpop.f32.mrf.mxu1 }
  0xfe   : > { %1682 = vst.msk [vmem:[%s2550_s30 + $0x14] sm:$0xf] %vm1676_vm4, %v2001_v22  ;;  %1714 = vst.msk [vmem:[%s2550_s30 + $0x94] sm:$0xf] %vm1676_vm4, %v2033_v23  ;;  %v1044_v48 = vadd.f32 %v2117_v42, %v412_v36  ;;  %v1076_v49 = vadd.f32 %v2149_v43, %v444_v37 }
  0xff   : > { %1102 = vst.msk [vmem:[#allocation2 + $0x60] sm:$0xff] %vm264_vm2, %v1037_v24  ;;  %1134 = vst.msk [vmem:[#allocation2 + $0x160] sm:$0xff] %vm264_vm2, %v1069_v25  ;;  %v1167_v40 = vld [vmem:[#allocation2 + $0x50] sm:$0xff]  ;;  %v837_v55 = vpop.f32.mrf.mxu0  ;;  %v965_v58 = vpop.f32.mrf.mxu1 }
 0x100   : > { %1105 = vst.msk [vmem:[#allocation2 + $0x78] sm:$0xff] %vm264_vm2, %v1040_v16  ;;  %1137 = vst.msk [vmem:[#allocation2 + $0x178] sm:$0xff] %vm264_vm2, %v1072_v29  ;;  %v1199_v41 = vld [vmem:[#allocation2 + $0x150] sm:$0xff]  ;;  %v1238_v46 = vadd.f32 %v2533_v1, %v1167_v40  ;;  %v1165_v52 = vld [vmem:[#allocation2 + $0x40] sm:$0xff]  ;;  %v1042_v3 = vadd.f32 %v837_v55, %v410_v50  ;;  %v1074_v4 = vadd.f32 %v965_v58, %v442_v51 }
 0x101   : > { %1103 = vst.msk [vmem:[#allocation2 + $0x68] sm:$0xff] %vm264_vm2, %v1038_v30  ;;  %1135 = vst.msk [vmem:[#allocation2 + $0x168] sm:$0xff] %vm264_vm2, %v1070_v31  ;;  %v1270_v47 = vadd.f32 %v2533_v1, %v1199_v41  ;;  %v1197_v53 = vld [vmem:[#allocation2 + $0x140] sm:$0xff]  ;;  %v1168_v54 = vld [vmem:[#allocation2 + $0x58] sm:$0xff]  ;;  %v1236_v61 = vadd.f32 %v2533_v1, %v1165_v52  ;;  %v2652_v7 = vpop.f32.mrf.mxu0  ;;  %v2654_v8 = vpop.f32.mrf.mxu1 }
 0x102   : > { %1108 = vst.msk [vmem:[#allocation2 + $0x90] sm:$0xff] %vm264_vm2, %v1043_v32  ;;  %1140 = vst.msk [vmem:[#allocation2 + $0x190] sm:$0xff] %vm264_vm2, %v1075_v33  ;;  %v1302_v59 = vmax.f32 %v1238_v46, 0.0  ;;  %v1268_v62 = vadd.f32 %v2533_v1, %v1197_v53  ;;  %v1200_v63 = vld [vmem:[#allocation2 + $0x158] sm:$0xff]  ;;  %v1239_v0 = vadd.f32 %v2533_v1, %v1168_v54 }
 0x103   : > { %1106 = vst.msk [vmem:[#allocation2 + $0x80] sm:$0xff] %vm264_vm2, %v1041_v38  ;;  %1138 = vst.msk [vmem:[#allocation2 + $0x180] sm:$0xff] %vm264_vm2, %v1073_v39  ;;  %v1334_v60 = vmax.f32 %v1270_v47, 0.0  ;;  %v1271_v44 = vadd.f32 %v2533_v1, %v1200_v63  ;;  %v1166_v45 = vld [vmem:[#allocation2 + $0x48] sm:$0xff]  ;;  %v1300_v11 = vmax.f32 %v1236_v61, 0.0  ;;  %v2660_v5 = vpop.f32.mrf.mxu0  ;;  %v2662_v6 = vpop.f32.mrf.mxu1 }
 0x104   : > { %1109 = vst.msk [vmem:[#allocation2 + $0x98] sm:$0xff] %vm264_vm2, %v1044_v48  ;;  %1141 = vst.msk [vmem:[#allocation2 + $0x198] sm:$0xff] %vm264_vm2, %v1076_v49  ;;  %v1198_v2 = vld [vmem:[#allocation2 + $0x148] sm:$0xff]  ;;  %v1366_v9 = vmin.f32 %v1302_v59, 6.0  ;;  %v1332_v12 = vmax.f32 %v1268_v62, 0.0  ;;  %v1303_v13 = vmax.f32 %v1239_v0, 0.0  ;;  %v1237_v17 = vadd.f32 %v2533_v1, %v1166_v45 }
 0x105   : > { %v1398_v10 = vmin.f32 %v1334_v60, 6.0  ;;  %v1335_v14 = vmax.f32 %v1271_v44, 0.0  ;;  %v1269_v18 = vadd.f32 %v2533_v1, %v1198_v2  ;;  %v1171_v56 = vld [vmem:[#allocation2 + $0x70] sm:$0xff]  ;;  %1107 = vst.msk [vmem:[#allocation2 + $0x88] sm:$0xff] %vm264_vm2, %v1042_v3  ;;  %1139 = vst.msk [vmem:[#allocation2 + $0x188] sm:$0xff] %vm264_vm2, %v1074_v4  ;;  %v1364_v21 = vmin.f32 %v1300_v11, 6.0  ;;  %v2664_v15 = vpop.f32.mrf.mxu0  ;;  %v2666_v16 = vpop.f32.mrf.mxu1 }
 0x106   : > { %v1203_v57 = vld [vmem:[#allocation2 + $0x170] sm:$0xff]  ;;  %v2006_v19 = vpack.c.bf16 %v1366_v9, %v1366_v9  ;;  %v1396_v22 = vmin.f32 %v1332_v12, 6.0  ;;  %v1367_v23 = vmin.f32 %v1303_v13, 6.0  ;;  %v1301_v25 = vmax.f32 %v1237_v17, 0.0  ;;  %v1169_v27 = vld [vmem:[#allocation2 + $0x60] sm:$0xff] }
 0x107   : > { %v2038_v20 = vpack.c.bf16 %v1398_v10, %v1398_v10  ;;  %v1399_v24 = vmin.f32 %v1335_v14, 6.0  ;;  %v1333_v26 = vmax.f32 %v1269_v18, 0.0  ;;  %v1201_v28 = vld [vmem:[#allocation2 + $0x160] sm:$0xff]  ;;  %v2004_v29 = vpack.c.bf16 %v1364_v21, %v1364_v21  ;;  %v1172_v33 = vld [vmem:[#allocation2 + $0x78] sm:$0xff]  ;;  %v2674_v39 = vpop.f32.mrf.mxu0  ;;  %v2676_v40 = vpop.f32.mrf.mxu1 }
 0x108   : > { %1687 = vst.msk [vmem:[%s2550_s30 + $0x28] sm:$0xf] %vm1676_vm4, %v2006_v19  ;;  %v2036_v30 = vpack.c.bf16 %v1396_v22, %v1396_v22  ;;  %v1242_v31 = vadd.f32 %v2533_v1, %v1171_v56  ;;  %v1274_v32 = vadd.f32 %v2533_v1, %v1203_v57  ;;  %v1204_v34 = vld [vmem:[#allocation2 + $0x178] sm:$0xff]  ;;  %v2007_v35 = vpack.c.bf16 %v1367_v23, %v1367_v23  ;;  %v1170_v47 = vld [vmem:[#allocation2 + $0x68] sm:$0xff] }
 0x109   : > { %1719 = vst.msk [vmem:[%s2550_s30 + $0xa8] sm:$0xf] %vm1676_vm4, %v2038_v20  ;;  %v2039_v36 = vpack.c.bf16 %v1399_v24, %v1399_v24  ;;  %v1365_v37 = vmin.f32 %v1301_v25, 6.0  ;;  %v1397_v38 = vmin.f32 %v1333_v26, 6.0  ;;  %1685 = vst.msk [vmem:[%s2550_s30 + $0x20] sm:$0xf] %vm1676_vm4, %v2004_v29  ;;  %v1240_v43 = vadd.f32 %v2533_v1, %v1169_v27  ;;  %v2690_v53 = vpop.f32.mrf.mxu0  ;;  %v2692_v54 = vpop.f32.mrf.mxu1 }
 0x10a   : > { %1717 = vst.msk [vmem:[%s2550_s30 + $0xa0] sm:$0xf] %vm1676_vm4, %v2036_v30  ;;  %v1306_v41 = vmax.f32 %v1242_v31, 0.0  ;;  %v1338_v42 = vmax.f32 %v1274_v32, 0.0  ;;  %v1272_v46 = vadd.f32 %v2533_v1, %v1201_v28  ;;  %v1202_v48 = vld [vmem:[#allocation2 + $0x168] sm:$0xff]  ;;  %v1243_v51 = vadd.f32 %v2533_v1, %v1172_v33  ;;  %v1175_v44 = vld [vmem:[#allocation2 + $0x90] sm:$0xff] }
 0x10b   : > { %1688 = vst.msk [vmem:[%s2550_s30 + $0x2c] sm:$0xf] %vm1676_vm4, %v2007_v35  ;;  %1720 = vst.msk [vmem:[%s2550_s30 + $0xac] sm:$0xf] %vm1676_vm4, %v2039_v36  ;;  %v2005_v49 = vpack.c.bf16 %v1365_v37, %v1365_v37  ;;  %v2037_v50 = vpack.c.bf16 %v1397_v38, %v1397_v38  ;;  %v1275_v52 = vadd.f32 %v2533_v1, %v1204_v34  ;;  %v1304_v59 = vmax.f32 %v1240_v43, 0.0  ;;  %v1207_v45 = vld [vmem:[#allocation2 + $0x190] sm:$0xff]  ;;  %v2700_v2 = vpop.f32.mrf.mxu0  ;;  %v2702_v3 = vpop.f32.mrf.mxu1 }
 0x10c   : > { %v1370_v55 = vmin.f32 %v1306_v41, 6.0  ;;  %v1402_v58 = vmin.f32 %v1338_v42, 6.0  ;;  %v1336_v60 = vmax.f32 %v1272_v46, 0.0  ;;  %v1307_v61 = vmax.f32 %v1243_v51, 0.0  ;;  %v1173_v18 = vld [vmem:[#allocation2 + $0x80] sm:$0xff]  ;;  %v1176_v24 = vld [vmem:[#allocation2 + $0x98] sm:$0xff] }
 0x10d   : > { %1686 = vst.msk [vmem:[%s2550_s30 + $0x24] sm:$0xf] %vm1676_vm4, %v2005_v49  ;;  %1718 = vst.msk [vmem:[%s2550_s30 + $0xa4] sm:$0xf] %vm1676_vm4, %v2037_v50  ;;  %v1339_v62 = vmax.f32 %v1275_v52, 0.0  ;;  %v1241_v63 = vadd.f32 %v2533_v1, %v1170_v47  ;;  %v1273_v0 = vadd.f32 %v2533_v1, %v1202_v48  ;;  %v1368_v10 = vmin.f32 %v1304_v59, 6.0  ;;  %v2704_v57 = vpop.f32.mrf.mxu0  ;;  %v2706_v19 = vpop.f32.mrf.mxu1 }
 0x10e   : > { %v2010_v4 = vpack.c.bf16 %v1370_v55, %v1370_v55  ;;  %v2042_v9 = vpack.c.bf16 %v1402_v58, %v1402_v58  ;;  %v1400_v11 = vmin.f32 %v1336_v60, 6.0  ;;  %v1371_v12 = vmin.f32 %v1307_v61, 6.0  ;;  %v1205_v56 = vld [vmem:[#allocation2 + $0x180] sm:$0xff]  ;;  %v1208_v25 = vld [vmem:[#allocation2 + $0x198] sm:$0xff]  ;;  %v1174_v36 = vld [vmem:[#allocation2 + $0x88] sm:$0xff] }
 0x10f   : > { %v1403_v13 = vmin.f32 %v1339_v62, 6.0  ;;  %v1305_v14 = vmax.f32 %v1241_v63, 0.0  ;;  %v1337_v17 = vmax.f32 %v1273_v0, 0.0  ;;  %v2008_v20 = vpack.c.bf16 %v1368_v10, %v1368_v10  ;;  %v2714_v30 = vpop.f32.mrf.mxu0  ;;  %v2716_v31 = vpop.f32.mrf.mxu1  ;;  %v1206_v37 = vld [vmem:[#allocation2 + $0x188] sm:$0xff]  ;;  %v415_v52 = vld [vmem:[#allocation2 + $0xb0] sm:$0xff]  ;;  %v413_v62 = vld [vmem:[#allocation2 + $0xa0] sm:$0xff] }
 0x110   : > { %1691 = vst.msk [vmem:[%s2550_s30 + $0x38] sm:$0xf] %vm1676_vm4, %v2010_v4  ;;  %1723 = vst.msk [vmem:[%s2550_s30 + $0xb8] sm:$0xf] %vm1676_vm4, %v2042_v9  ;;  %v2040_v21 = vpack.c.bf16 %v1400_v11, %v1400_v11  ;;  %v1246_v22 = vadd.f32 %v2533_v1, %v1175_v44  ;;  %v1278_v23 = vadd.f32 %v2533_v1, %v1207_v45  ;;  %v447_v61 = vld [vmem:[#allocation2 + $0x1b0] sm:$0xff]  ;;  %v445_v63 = vld [vmem:[#allocation2 + $0x1a0] sm:$0xff] }
 0x111   : > { %v2011_v26 = vpack.c.bf16 %v1371_v12, %v1371_v12  ;;  %v2043_v27 = vpack.c.bf16 %v1403_v13, %v1403_v13  ;;  %v1369_v28 = vmin.f32 %v1305_v14, 6.0  ;;  %v1401_v29 = vmin.f32 %v1337_v17, 6.0  ;;  %1689 = vst.msk [vmem:[%s2550_s30 + $0x30] sm:$0xf] %vm1676_vm4, %v2008_v20  ;;  %v2730_v46 = vpop.f32.mrf.mxu0  ;;  %v2732_v47 = vpop.f32.mrf.mxu1  ;;  %v416_v11 = vld [vmem:[#allocation2 + $0xb8] sm:$0xff]  ;;  %v414_v13 = vld [vmem:[#allocation2 + $0xa8] sm:$0xff] }
 0x112   : > { %1721 = vst.msk [vmem:[%s2550_s30 + $0xb0] sm:$0xf] %vm1676_vm4, %v2040_v21  ;;  %v1310_v32 = vmax.f32 %v1246_v22, 0.0  ;;  %v1342_v33 = vmax.f32 %v1278_v23, 0.0  ;;  %v1244_v34 = vadd.f32 %v2533_v1, %v1173_v18  ;;  %v1276_v35 = vadd.f32 %v2533_v1, %v1205_v56  ;;  %v448_v12 = vld [vmem:[#allocation2 + $0x1b8] sm:$0xff]  ;;  %v446_v20 = vld [vmem:[#allocation2 + $0x1a8] sm:$0xff] }
 0x113   : > { %1692 = vst.msk [vmem:[%s2550_s30 + $0x3c] sm:$0xf] %vm1676_vm4, %v2011_v26  ;;  %1724 = vst.msk [vmem:[%s2550_s30 + $0xbc] sm:$0xf] %vm1676_vm4, %v2043_v27  ;;  %v2009_v38 = vpack.c.bf16 %v1369_v28, %v1369_v28  ;;  %v2041_v41 = vpack.c.bf16 %v1401_v29, %v1401_v29  ;;  %v1247_v42 = vadd.f32 %v2533_v1, %v1176_v24  ;;  %v2740_v0 = vpop.f32.mrf.mxu0  ;;  %v2742_v44 = vpop.f32.mrf.mxu1  ;;  %v419_v21 = vld [vmem:[#allocation2 + $0xd0] sm:$0xff]  ;;  %v417_v27 = vld [vmem:[#allocation2 + $0xc0] sm:$0xff] }
 0x114   : > { %v1279_v43 = vadd.f32 %v2533_v1, %v1208_v25  ;;  %v1374_v48 = vmin.f32 %v1310_v32, 6.0  ;;  %v1406_v49 = vmin.f32 %v1342_v33, 6.0  ;;  %v1308_v50 = vmax.f32 %v1244_v34, 0.0  ;;  %v451_v26 = vld [vmem:[#allocation2 + $0x1d0] sm:$0xff]  ;;  %v449_v28 = vld [vmem:[#allocation2 + $0x1c0] sm:$0xff] }
 0x115   : > { %v1340_v51 = vmax.f32 %v1276_v35, 0.0  ;;  %1690 = vst.msk [vmem:[%s2550_s30 + $0x34] sm:$0xf] %vm1676_vm4, %v2009_v38  ;;  %1722 = vst.msk [vmem:[%s2550_s30 + $0xb4] sm:$0xf] %vm1676_vm4, %v2041_v41  ;;  %v1311_v55 = vmax.f32 %v1247_v42, 0.0  ;;  %v1245_v59 = vadd.f32 %v2533_v1, %v1174_v36  ;;  %v1277_v60 = vadd.f32 %v2533_v1, %v1206_v37  ;;  %v2129_v29 = vpop.f32.mrf.mxu0  ;;  %v2161_v32 = vpop.f32.mrf.mxu1 }
 0x116   : > { %v1343_v58 = vmax.f32 %v1279_v43, 0.0  ;;  %v2014_v45 = vpack.c.bf16 %v1374_v48, %v1374_v48  ;;  %v2046_v4 = vpack.c.bf16 %v1406_v49, %v1406_v49  ;;  %v1372_v9 = vmin.f32 %v1308_v50, 6.0  ;;  %v420_v37 = vld [vmem:[#allocation2 + $0xd8] sm:$0xff]  ;;  %v418_v41 = vld [vmem:[#allocation2 + $0xc8] sm:$0xff]  ;;  %v423_v49 = vld [vmem:[#allocation2 + $0xf0] sm:$0xff] }
 0x117   : > { %v1404_v10 = vmin.f32 %v1340_v51, 6.0  ;;  %v1375_v14 = vmin.f32 %v1311_v55, 6.0  ;;  %v1309_v18 = vmax.f32 %v1245_v59, 0.0  ;;  %v1341_v56 = vmax.f32 %v1277_v60, 0.0  ;;  %v452_v38 = vld [vmem:[#allocation2 + $0x1d8] sm:$0xff]  ;;  %v450_v48 = vld [vmem:[#allocation2 + $0x1c8] sm:$0xff] }
 0x118   : > { %v1407_v17 = vmin.f32 %v1343_v58, 6.0  ;;  %1695 = vst.msk [vmem:[%s2550_s30 + $0x48] sm:$0xf] %vm1676_vm4, %v2014_v45  ;;  %1727 = vst.msk [vmem:[%s2550_s30 + $0xc8] sm:$0xf] %vm1676_vm4, %v2046_v4  ;;  %v2012_v22 = vpack.c.bf16 %v1372_v9, %v1372_v9  ;;  %v1047_v24 = vadd.f32 %v2652_v7, %v415_v52  ;;  %v1079_v25 = vadd.f32 %v2654_v8, %v447_v61  ;;  %v455_v50 = vld [vmem:[#allocation2 + $0x1f0] sm:$0xff]  ;;  %v1013_v45 = vpop.f32.mrf.mxu1 }
 0x119   : > { %v2044_v23 = vpack.c.bf16 %v1404_v10, %v1404_v10  ;;  %v2015_v33 = vpack.c.bf16 %v1375_v14, %v1375_v14  ;;  %v1373_v35 = vmin.f32 %v1309_v18, 6.0  ;;  %v1405_v36 = vmin.f32 %v1341_v56, 6.0  ;;  %v456_v60 = vld [vmem:[#allocation2 + $0x1f8] sm:$0xff]  ;;  %v422_v61 = vld [vmem:[#allocation2 + $0xe8] sm:$0xff] }
 0x11a   : > { %v2047_v34 = vpack.c.bf16 %v1407_v17, %v1407_v17  ;;  %1693 = vst.msk [vmem:[%s2550_s30 + $0x40] sm:$0xf] %vm1676_vm4, %v2012_v22  ;;  %v1045_v7 = vadd.f32 %v2660_v5, %v413_v62  ;;  %v1077_v8 = vadd.f32 %v2662_v6, %v445_v63  ;;  %v1048_v42 = vadd.f32 %v2664_v15, %v416_v11  ;;  %v421_v5 = vld [vmem:[#allocation2 + $0xe0] sm:$0xff]  ;;  %v424_v15 = vld [vmem:[#allocation2 + $0xf8] sm:$0xff]  ;;  %v885_v62 = vpop.f32.mrf.mxu0  ;;  %v454_v63 = vld [vmem:[#allocation2 + $0x1e8] sm:$0xff] }
 0x11b   : > { %1725 = vst.msk [vmem:[%s2550_s30 + $0xc0] sm:$0xf] %vm1676_vm4, %v2044_v23  ;;  %v1080_v43 = vadd.f32 %v2666_v16, %v448_v12  ;;  %1696 = vst.msk [vmem:[%s2550_s30 + $0x4c] sm:$0xf] %vm1676_vm4, %v2015_v33  ;;  %v2013_v51 = vpack.c.bf16 %v1373_v35, %v1373_v35  ;;  %v2045_v52 = vpack.c.bf16 %v1405_v36, %v1405_v36  ;;  %v453_v6 = vld [vmem:[#allocation2 + $0x1e0] sm:$0xff] }
 0x11c   : > { %1112 = vst.msk [vmem:[#allocation2 + $0xb0] sm:$0xff] %vm264_vm2, %v1047_v24  ;;  %1144 = vst.msk [vmem:[#allocation2 + $0x1b0] sm:$0xff] %vm264_vm2, %v1079_v25  ;;  %v1046_v55 = vadd.f32 %v2674_v39, %v414_v13  ;;  %v1078_v58 = vadd.f32 %v2676_v40, %v446_v20  ;;  %v1051_v16 = vadd.f32 %v2690_v53, %v419_v21 }
 0x11d   : > { %1728 = vst.msk [vmem:[%s2550_s30 + $0xcc] sm:$0xf] %vm1676_vm4, %v2047_v34  ;;  %v1083_v59 = vadd.f32 %v2692_v54, %v451_v26  ;;  %v1049_v39 = vadd.f32 %v2700_v2, %v417_v27  ;;  %v1081_v40 = vadd.f32 %v2702_v3, %v449_v28  ;;  %1694 = vst.msk [vmem:[%s2550_s30 + $0x44] sm:$0xf] %vm1676_vm4, %v2013_v51 }
 0x11e   : > { %1110 = vst.msk [vmem:[#allocation2 + $0xa0] sm:$0xff] %vm264_vm2, %v1045_v7  ;;  %1142 = vst.msk [vmem:[#allocation2 + $0x1a0] sm:$0xff] %vm264_vm2, %v1077_v8  ;;  %v1052_v53 = vadd.f32 %v2704_v57, %v420_v37  ;;  %v1084_v54 = vadd.f32 %v2706_v19, %v452_v38  ;;  %v1050_v2 = vadd.f32 %v2714_v30, %v418_v41 }
 0x11f   : > { %1113 = vst.msk [vmem:[#allocation2 + $0xb8] sm:$0xff] %vm264_vm2, %v1048_v42  ;;  %1145 = vst.msk [vmem:[#allocation2 + $0x1b8] sm:$0xff] %vm264_vm2, %v1080_v43  ;;  %v1082_v3 = vadd.f32 %v2716_v31, %v450_v48  ;;  %v1055_v4 = vadd.f32 %v2730_v46, %v423_v49  ;;  %v1087_v9 = vadd.f32 %v2732_v47, %v455_v50 }
 0x120   : > { %1726 = vst.msk [vmem:[%s2550_s30 + $0xc4] sm:$0xf] %vm1676_vm4, %v2045_v52  ;;  %v1053_v57 = vadd.f32 %v2740_v0, %v421_v5  ;;  %v1085_v19 = vadd.f32 %v2742_v44, %v453_v6  ;;  %v1056_v30 = vadd.f32 %v2129_v29, %v424_v15  ;;  %v1088_v31 = vadd.f32 %v2161_v32, %v456_v60 }
 0x121   : > { %1111 = vst.msk [vmem:[#allocation2 + $0xa8] sm:$0xff] %vm264_vm2, %v1046_v55  ;;  %1143 = vst.msk [vmem:[#allocation2 + $0x1a8] sm:$0xff] %vm264_vm2, %v1078_v58  ;;  %v1054_v10 = vadd.f32 %v885_v62, %v422_v61  ;;  %v1086_v11 = vadd.f32 %v1013_v45, %v454_v63 }
 0x122   : > { %1116 = vst.msk [vmem:[#allocation2 + $0xd0] sm:$0xff] %vm264_vm2, %v1051_v16  ;;  %1148 = vst.msk [vmem:[#allocation2 + $0x1d0] sm:$0xff] %vm264_vm2, %v1083_v59 }
 0x123   : > { %1114 = vst.msk [vmem:[#allocation2 + $0xc0] sm:$0xff] %vm264_vm2, %v1049_v39  ;;  %1146 = vst.msk [vmem:[#allocation2 + $0x1c0] sm:$0xff] %vm264_vm2, %v1081_v40  ;;  %v1179_v46 = vld [vmem:[#allocation2 + $0xb0] sm:$0xff] }
 0x124   : > { %1117 = vst.msk [vmem:[#allocation2 + $0xd8] sm:$0xff] %vm264_vm2, %v1052_v53  ;;  %1149 = vst.msk [vmem:[#allocation2 + $0x1d8] sm:$0xff] %vm264_vm2, %v1084_v54  ;;  %v1211_v47 = vld [vmem:[#allocation2 + $0x1b0] sm:$0xff]  ;;  %v1250_v0 = vadd.f32 %v2533_v1, %v1179_v46 }
 0x125   : > { %1115 = vst.msk [vmem:[#allocation2 + $0xc8] sm:$0xff] %vm264_vm2, %v1050_v2  ;;  %1147 = vst.msk [vmem:[#allocation2 + $0x1c8] sm:$0xff] %vm264_vm2, %v1082_v3  ;;  %v1282_v44 = vadd.f32 %v2533_v1, %v1211_v47  ;;  %v1177_v12 = vld [vmem:[#allocation2 + $0xa0] sm:$0xff] }
 0x126   : > { %1120 = vst.msk [vmem:[#allocation2 + $0xf0] sm:$0xff] %vm264_vm2, %v1055_v4  ;;  %1152 = vst.msk [vmem:[#allocation2 + $0x1f0] sm:$0xff] %vm264_vm2, %v1087_v9  ;;  %v1209_v13 = vld [vmem:[#allocation2 + $0x1a0] sm:$0xff]  ;;  %v1180_v14 = vld [vmem:[#allocation2 + $0xb8] sm:$0xff]  ;;  %v1314_v17 = vmax.f32 %v1250_v0, 0.0  ;;  %v1248_v56 = vadd.f32 %v2533_v1, %v1177_v12 }
 0x127   : > { %1118 = vst.msk [vmem:[#allocation2 + $0xe0] sm:$0xff] %vm264_vm2, %v1053_v57  ;;  %1150 = vst.msk [vmem:[#allocation2 + $0x1e0] sm:$0xff] %vm264_vm2, %v1085_v19  ;;  %v1346_v18 = vmax.f32 %v1282_v44, 0.0  ;;  %v1280_v20 = vadd.f32 %v2533_v1, %v1209_v13  ;;  %v1212_v21 = vld [vmem:[#allocation2 + $0x1b8] sm:$0xff]  ;;  %v1251_v24 = vadd.f32 %v2533_v1, %v1180_v14 }
 0x128   : > { %1121 = vst.msk [vmem:[#allocation2 + $0xf8] sm:$0xff] %vm264_vm2, %v1056_v30  ;;  %1153 = vst.msk [vmem:[#allocation2 + $0x1f8] sm:$0xff] %vm264_vm2, %v1088_v31  ;;  %v1178_v22 = vld [vmem:[#allocation2 + $0xa8] sm:$0xff]  ;;  %v1283_v25 = vadd.f32 %v2533_v1, %v1212_v21  ;;  %v1378_v28 = vmin.f32 %v1314_v17, 6.0  ;;  %v1312_v32 = vmax.f32 %v1248_v56, 0.0 }
 0x129   : > { %1119 = vst.msk [vmem:[#allocation2 + $0xe8] sm:$0xff] %vm264_vm2, %v1054_v10  ;;  %1151 = vst.msk [vmem:[#allocation2 + $0x1e8] sm:$0xff] %vm264_vm2, %v1086_v11  ;;  %v1210_v23 = vld [vmem:[#allocation2 + $0x1a8] sm:$0xff]  ;;  %v1249_v26 = vadd.f32 %v2533_v1, %v1178_v22  ;;  %v1410_v29 = vmin.f32 %v1346_v18, 6.0  ;;  %v1344_v33 = vmax.f32 %v1280_v20, 0.0  ;;  %v1315_v34 = vmax.f32 %v1251_v24, 0.0 }
 0x12a   : > { %v1281_v27 = vadd.f32 %v2533_v1, %v1210_v23  ;;  %v1347_v35 = vmax.f32 %v1283_v25, 0.0  ;;  %v1183_v38 = vld [vmem:[#allocation2 + $0xd0] sm:$0xff]  ;;  %v2018_v7 = vpack.c.bf16 %v1378_v28, %v1378_v28  ;;  %v1376_v42 = vmin.f32 %v1312_v32, 6.0  ;;  %v1181_v48 = vld [vmem:[#allocation2 + $0xc0] sm:$0xff] }
 0x12b   : > { %v1313_v36 = vmax.f32 %v1249_v26, 0.0  ;;  %v1215_v41 = vld [vmem:[#allocation2 + $0x1d0] sm:$0xff]  ;;  %v2050_v8 = vpack.c.bf16 %v1410_v29, %v1410_v29  ;;  %v1408_v43 = vmin.f32 %v1344_v33, 6.0  ;;  %v1379_v49 = vmin.f32 %v1315_v34, 6.0  ;;  %v1213_v55 = vld [vmem:[#allocation2 + $0x1c0] sm:$0xff]  ;;  %v1184_v58 = vld [vmem:[#allocation2 + $0xd8] sm:$0xff] }
 0x12c   : > { %v1345_v37 = vmax.f32 %v1281_v27, 0.0  ;;  %v1411_v50 = vmin.f32 %v1347_v35, 6.0  ;;  %1699 = vst.msk [vmem:[%s2550_s30 + $0x58] sm:$0xf] %vm1676_vm4, %v2018_v7  ;;  %v2016_v5 = vpack.c.bf16 %v1376_v42, %v1376_v42  ;;  %v1254_v15 = vadd.f32 %v2533_v1, %v1183_v38  ;;  %v1216_v59 = vld [vmem:[#allocation2 + $0x1d8] sm:$0xff]  ;;  %v1182_v39 = vld [vmem:[#allocation2 + $0xc8] sm:$0xff] }
 0x12d   : > { %v1377_v51 = vmin.f32 %v1313_v36, 6.0  ;;  %1731 = vst.msk [vmem:[%s2550_s30 + $0xd8] sm:$0xf] %vm1676_vm4, %v2050_v8  ;;  %v2048_v6 = vpack.c.bf16 %v1408_v43, %v1408_v43  ;;  %v1286_v16 = vadd.f32 %v2533_v1, %v1215_v41  ;;  %v1214_v40 = vld [vmem:[#allocation2 + $0x1c8] sm:$0xff]  ;;  %v2019_v60 = vpack.c.bf16 %v1379_v49, %v1379_v49  ;;  %v2226_v1 = vld [vmem:[%s2876_s2] ss:$0 sm:$0xff] }
 0x12e   : > { %v1409_v52 = vmin.f32 %v1345_v37, 6.0  ;;  %v2051_v61 = vpack.c.bf16 %v1411_v50, %v1411_v50  ;;  %1697 = vst.msk [vmem:[%s2550_s30 + $0x50] sm:$0xf] %vm1676_vm4, %v2016_v5  ;;  %v1318_v45 = vmax.f32 %v1254_v15, 0.0  ;;  %v1252_v54 = vadd.f32 %v2226_v1, %v1181_v48  ;;  %v1187_v44 = vld [vmem:[#allocation2 + $0xf0] sm:$0xff]  ;;  %v1185_v56 = vld [vmem:[#allocation2 + $0xe0] sm:$0xff] }
 0x12f   : > { %v2017_v62 = vpack.c.bf16 %v1377_v51, %v1377_v51  ;;  %1729 = vst.msk [vmem:[%s2550_s30 + $0xd0] sm:$0xf] %vm1676_vm4, %v2048_v6  ;;  %v1350_v53 = vmax.f32 %v1286_v16, 0.0  ;;  %v1284_v2 = vadd.f32 %v2226_v1, %v1213_v55  ;;  %1700 = vst.msk [vmem:[%s2550_s30 + $0x5c] sm:$0xf] %vm1676_vm4, %v2019_v60  ;;  %v1255_v3 = vadd.f32 %v2226_v1, %v1184_v58  ;;  %v1219_v12 = vld [vmem:[#allocation2 + $0x1f0] sm:$0xff] }
 0x130   : > { %v2049_v63 = vpack.c.bf16 %v1409_v52, %v1409_v52  ;;  %1732 = vst.msk [vmem:[%s2550_s30 + $0xdc] sm:$0xf] %vm1676_vm4, %v2051_v61  ;;  %v1287_v4 = vadd.f32 %v2226_v1, %v1216_v59  ;;  %v1253_v9 = vadd.f32 %v2226_v1, %v1182_v39  ;;  %v1285_v57 = vadd.f32 %v2226_v1, %v1214_v40  ;;  %v1217_v24 = vld [vmem:[#allocation2 + $0x1e0] sm:$0xff]  ;;  %v1188_v25 = vld [vmem:[#allocation2 + $0xf8] sm:$0xff]  ;;  %v1186_v33 = vld [vmem:[#allocation2 + $0xe8] sm:$0xff] }
 0x131   : > { %1698 = vst.msk [vmem:[%s2550_s30 + $0x54] sm:$0xf] %vm1676_vm4, %v2017_v62  ;;  %v1382_v19 = vmin.f32 %v1318_v45, 6.0  ;;  %v1414_v30 = vmin.f32 %v1350_v53, 6.0  ;;  %v1316_v31 = vmax.f32 %v1252_v54, 0.0  ;;  %v1348_v10 = vmax.f32 %v1284_v2, 0.0 }
 0x132   : > { %1730 = vst.msk [vmem:[%s2550_s30 + $0xd4] sm:$0xf] %vm1676_vm4, %v2049_v63  ;;  %v1319_v11 = vmax.f32 %v1255_v3, 0.0  ;;  %v1351_v46 = vmax.f32 %v1287_v4, 0.0  ;;  %v1317_v47 = vmax.f32 %v1253_v9, 0.0  ;;  %v1349_v0 = vmax.f32 %v1285_v57, 0.0 }
 0x133   : > { %v2022_v13 = vpack.c.bf16 %v1382_v19, %v1382_v19  ;;  %v2054_v14 = vpack.c.bf16 %v1414_v30, %v1414_v30  ;;  %v1380_v17 = vmin.f32 %v1316_v31, 6.0  ;;  %v1412_v18 = vmin.f32 %v1348_v10, 6.0  ;;  %v1220_v32 = vld [vmem:[#allocation2 + $0x1f8] sm:$0xff]  ;;  %v1218_v34 = vld [vmem:[#allocation2 + $0x1e8] sm:$0xff] }
 0x134   : > { %v1383_v20 = vmin.f32 %v1319_v11, 6.0  ;;  %v1415_v21 = vmin.f32 %v1351_v46, 6.0  ;;  %v1381_v22 = vmin.f32 %v1317_v47, 6.0  ;;  %v1413_v23 = vmin.f32 %v1349_v0, 6.0 }
 0x135   : > { %1703 = vst.msk [vmem:[%s2550_s30 + $0x68] sm:$0xf] %vm1676_vm4, %v2022_v13  ;;  %1735 = vst.msk [vmem:[%s2550_s30 + $0xe8] sm:$0xf] %vm1676_vm4, %v2054_v14  ;;  %v2020_v26 = vpack.c.bf16 %v1380_v17, %v1380_v17  ;;  %v2052_v27 = vpack.c.bf16 %v1412_v18, %v1412_v18  ;;  %v1258_v28 = vadd.f32 %v2226_v1, %v1187_v44 }
 0x136   : > { %v1290_v29 = vadd.f32 %v2226_v1, %v1219_v12  ;;  %v2023_v35 = vpack.c.bf16 %v1383_v20, %v1383_v20  ;;  %v2055_v36 = vpack.c.bf16 %v1415_v21, %v1415_v21  ;;  %v2021_v37 = vpack.c.bf16 %v1381_v22, %v1381_v22 }
 0x137   : > { %v2053_v38 = vpack.c.bf16 %v1413_v23, %v1413_v23  ;;  %1701 = vst.msk [vmem:[%s2550_s30 + $0x60] sm:$0xf] %vm1676_vm4, %v2020_v26  ;;  %1733 = vst.msk [vmem:[%s2550_s30 + $0xe0] sm:$0xf] %vm1676_vm4, %v2052_v27  ;;  %v1322_v41 = vmax.f32 %v1258_v28, 0.0  ;;  %v1256_v8 = vadd.f32 %v2226_v1, %v1185_v56  ;;  %v1288_v42 = vadd.f32 %v2226_v1, %v1217_v24 }
 0x138   : > { %v1354_v7 = vmax.f32 %v1290_v29, 0.0  ;;  %1704 = vst.msk [vmem:[%s2550_s30 + $0x6c] sm:$0xf] %vm1676_vm4, %v2023_v35  ;;  %1736 = vst.msk [vmem:[%s2550_s30 + $0xec] sm:$0xf] %vm1676_vm4, %v2055_v36  ;;  %v1259_v43 = vadd.f32 %v2226_v1, %v1188_v25  ;;  %v1291_v48 = vadd.f32 %v2226_v1, %v1220_v32  ;;  %v1257_v49 = vadd.f32 %v2226_v1, %v1186_v33 }
 0x139   : > { %1702 = vst.msk [vmem:[%s2550_s30 + $0x64] sm:$0xf] %vm1676_vm4, %v2021_v37  ;;  %1734 = vst.msk [vmem:[%s2550_s30 + $0xe4] sm:$0xf] %vm1676_vm4, %v2053_v38  ;;  %v1289_v50 = vadd.f32 %v2226_v1, %v1218_v34  ;;  %v1386_v51 = vmin.f32 %v1322_v41, 6.0  ;;  %v1320_v55 = vmax.f32 %v1256_v8, 0.0 }
 0x13a   : > { %v1418_v52 = vmin.f32 %v1354_v7, 6.0  ;;  %v1352_v58 = vmax.f32 %v1288_v42, 0.0  ;;  %v1323_v5 = vmax.f32 %v1259_v43, 0.0  ;;  %v1355_v6 = vmax.f32 %v1291_v48, 0.0 }
 0x13b   : > { %v1321_v15 = vmax.f32 %v1257_v49, 0.0  ;;  %v1353_v16 = vmax.f32 %v1289_v50, 0.0  ;;  %v2026_v59 = vpack.c.bf16 %v1386_v51, %v1386_v51  ;;  %v1384_v40 = vmin.f32 %v1320_v55, 6.0 }
 0x13c   : > { %v2058_v39 = vpack.c.bf16 %v1418_v52, %v1418_v52  ;;  %v1416_v60 = vmin.f32 %v1352_v58, 6.0  ;;  %v1387_v61 = vmin.f32 %v1323_v5, 6.0  ;;  %v1419_v62 = vmin.f32 %v1355_v6, 6.0 }
 0x13d   : > { %v1385_v63 = vmin.f32 %v1321_v15, 6.0  ;;  %v1417_v45 = vmin.f32 %v1353_v16, 6.0  ;;  %1707 = vst.msk [vmem:[%s2550_s30 + $0x78] sm:$0xf] %vm1676_vm4, %v2026_v59  ;;  %v2024_v53 = vpack.c.bf16 %v1384_v40, %v1384_v40 }
 0x13e   : > { %1739 = vst.msk [vmem:[%s2550_s30 + $0xf8] sm:$0xf] %vm1676_vm4, %v2058_v39  ;;  %v2056_v1 = vpack.c.bf16 %v1416_v60, %v1416_v60  ;;  %v2027_v54 = vpack.c.bf16 %v1387_v61, %v1387_v61  ;;  %v2059_v2 = vpack.c.bf16 %v1419_v62, %v1419_v62 }
 0x13f   : > { %v2025_v3 = vpack.c.bf16 %v1385_v63, %v1385_v63  ;;  %v2057_v4 = vpack.c.bf16 %v1417_v45, %v1417_v45  ;;  %1705 = vst.msk [vmem:[%s2550_s30 + $0x70] sm:$0xf] %vm1676_vm4, %v2024_v53 }
 0x140   : > { %1737 = vst.msk [vmem:[%s2550_s30 + $0xf0] sm:$0xf] %vm1676_vm4, %v2056_v1  ;;  %1708 = vst.msk [vmem:[%s2550_s30 + $0x7c] sm:$0xf] %vm1676_vm4, %v2027_v54 }
 0x141   : > { %1740 = vst.msk [vmem:[%s2550_s30 + $0xfc] sm:$0xf] %vm1676_vm4, %v2059_v2  ;;  %1706 = vst.msk [vmem:[%s2550_s30 + $0x74] sm:$0xf] %vm1676_vm4, %v2025_v3 }
 0x142   : > { %1738 = vst.msk [vmem:[%s2550_s30 + $0xf4] sm:$0xf] %vm1676_vm4, %v2057_v4 }
 0x143 PF: > { %s13_s14 = sadd.s32 1, %s2249_s14   ;;  %s2879_s12 = smov %s2245_s13 }
 0x144   : > { %p10_p5 = scmp.ge.s32.totalorder %s13_s14, 6   ;;  %s2880_s13 = smov %s2882_s15 }
 0x146   :  { %12 = sbr.rel (!%p10_p5) target bundleno = 2 (0x2), region = 76 }

</bundles_post_ra>
